<compile_context>
chip_gen: v5e
topology: v5e:2x2
jax: 0.10.0
libtpu: 0.0.40
codegen_flags: <defaults>
</compile_context>

<pallas_src>
import math

import jax
import jax.numpy as jnp
from jax import lax
from jax.experimental import pallas as pl
from jax.experimental.pallas import tpu as pltpu  # noqa: F401

# ---------------- configuration (small, deterministic) ----------------
B = 2           # batch
S = 8           # sequence length
H = 32          # hidden size (n_embd)
NH = 4          # number of heads
D = H // NH     # head dim
INNER = 4 * H   # n_inner (MLP inner dim)
EPS = 1e-5      # layer_norm_epsilon
NEG = float(jnp.finfo(jnp.float32).min)  # GPT-2 masked-score fill value


def _gelu_new(x):
    # GPT-2 "gelu_new" (tanh approximation), computed in f32 on the VPU/EUP.
    return 0.5 * x * (1.0 + jnp.tanh(
        math.sqrt(2.0 / math.pi) * (x + 0.044715 * x * x * x)))


def _layer_norm(x, gamma, beta):
    mu = jnp.mean(x, axis=-1, keepdims=True)
    var = jnp.mean((x - mu) ** 2, axis=-1, keepdims=True)
    return (x - mu) * lax.rsqrt(var + EPS) * gamma + beta


# ---------------- the fused kernel (single invocation, no grid) --------------
def classic_block_kernel(
    x_ref,                        # (B, S, H)
    ln1g_ref, ln1b_ref,           # (1, H)
    wqkv_ref, bqkv_ref,           # (3*NH*B, H, D), (3*NH*B, 1, D)   z=(t,h,b)
    wo_ref, bo_ref,               # (NH*B, D, H),  (1, H)            z=(h,b)
    ln2g_ref, ln2b_ref,           # (1, H)
    wfc_ref, bfc_ref,             # (B, H, INNER), (1, INNER)
    wpr_ref, bpr_ref,             # (B, INNER, H), (1, H)
    y_ref,                        # (B, S, H)
    aw_ref,                       # (NH, B, S, S)  (wrapper transposes to (B,NH,S,S))
):
    x = x_ref[...]                                           # (B, S, H) f32

    # ---- LayerNorm 1 ----
    xn = _layer_norm(x, ln1g_ref[...], ln1b_ref[...])        # (B, S, H)

    # ---- QKV projection: one batched contraction over z = (q/k/v, head, batch)
    ZB = 3 * NH * B
    xb = jnp.broadcast_to(xn, (3 * NH, B, S, H)).reshape(ZB, S, H)
    qkv = jnp.einsum('zsh,zhd->zsd', xb, wqkv_ref[...],
                     preferred_element_type=jnp.float32) + bqkv_ref[...]   # (ZB,S,D)

    HB = NH * B
    q = qkv[0 * HB:1 * HB]        # (HB, S, D), leading index = h*B + b
    k = qkv[1 * HB:2 * HB]
    v = qkv[2 * HB:3 * HB]

    # ---- scores + causal mask + softmax, batched over (head, batch) ----
    scale = 1.0 / math.sqrt(D)
    scores = jnp.einsum('zqd,zkd->zqk', q, k,
                        preferred_element_type=jnp.float32) * scale        # (HB,S,S)
    row = lax.broadcasted_iota(jnp.int32, (S, S), 0)
    col = lax.broadcasted_iota(jnp.int32, (S, S), 1)
    causal = row >= col                                       # built once
    scores = jnp.where(causal, scores, NEG)
    scores = scores - jnp.max(scores, axis=-1, keepdims=True)
    e = jnp.exp(scores)
    p = e * pl.reciprocal(jnp.sum(e, axis=-1, keepdims=True), approx=True)  # (HB,S,S)

    # single attention-weight store (all heads / batches at once)
    aw_ref[...] = p.reshape(NH, B, S, S)

    # ---- context + output projection ----
    ctx = jnp.einsum('zqk,zkd->zqd', p, v,
                     preferred_element_type=jnp.float32)                   # (HB,S,D)
    # concat(heads) @ Wo  ==  sum_h ctx_h @ Wo_h   (no concatenate / relayout)
    attn_z = jnp.einsum('zsd,zdh->zsh', ctx, wo_ref[...],
                        preferred_element_type=jnp.float32)                # (HB,S,H)
    attn_out = jnp.sum(attn_z.reshape(NH, B, S, H), axis=0) + bo_ref[...]  # (B,S,H)

    h1 = x + attn_out                                        # residual 1

    # ---- LayerNorm 2 + MLP (GELU-new) ----
    h1n = _layer_norm(h1, ln2g_ref[...], ln2b_ref[...])
    ff = jnp.einsum('bsh,bhi->bsi', h1n, wfc_ref[...],
                    preferred_element_type=jnp.float32) + bfc_ref[...]     # (B,S,I)
    ff = _gelu_new(ff)
    ff = jnp.einsum('bsi,bih->bsh', ff, wpr_ref[...],
                    preferred_element_type=jnp.float32) + bpr_ref[...]     # (B,S,H)

    y_ref[...] = (h1 + ff).astype(y_ref.dtype)               # residual 2


# ---------------- wrapper ----------------
@jax.jit
def classic_block(x, params):
    (ln1g, ln1b, wqkv, bqkv, wo, bo, ln2g, ln2b, wfc, bfc, wpr, bpr) = params

    # ---- restructure weights on the XLA side (free; keeps the kernel relayout-free)
    # per-(qkv, head, batch) projection weights: z index = (t*NH + h)*B + b
    w3 = wqkv.reshape(H, 3, NH, D).transpose(1, 2, 0, 3)              # (3,NH,H,D)
    wqkv_z = jnp.broadcast_to(w3[:, :, None], (3, NH, B, H, D)).reshape(3 * NH * B, H, D)
    b3 = bqkv.reshape(3, NH, 1, D)
    bqkv_z = jnp.broadcast_to(b3[:, :, None], (3, NH, B, 1, D)).reshape(3 * NH * B, 1, D)
    # per-(head, batch) output-projection weights: z index = h*B + b
    wo_h = wo.reshape(NH, D, H)
    wo_z = jnp.broadcast_to(wo_h[:, None], (NH, B, D, H)).reshape(NH * B, D, H)
    # batch-broadcast MLP weights (batched einsum with a single leading batch dim)
    wfc_b = jnp.broadcast_to(wfc[None], (B, H, INNER))
    wpr_b = jnp.broadcast_to(wpr[None], (B, INNER, H))

    y, aw_hb = pl.pallas_call(
        classic_block_kernel,
        out_shape=[
            jax.ShapeDtypeStruct((B, S, H), jnp.float32),
            jax.ShapeDtypeStruct((NH, B, S, S), jnp.float32),
        ],
    )(x, ln1g, ln1b, wqkv_z, bqkv_z, wo_z, bo, ln2g, ln2b, wfc_b, bfc, wpr_b, bpr)

    # (NH, B, S, S) -> (B, NH, S, S), free XLA-side transpose
    return y, jnp.transpose(aw_hb, (1, 0, 2, 3))


# ---------------- pure-JAX reference (for correctness check) ----------------
def classic_block_ref(x, params):
    (ln1g, ln1b, wqkv, bqkv, wo, bo, ln2g, ln2b, wfc, bfc, wpr, bpr) = params

    def ln(v, g, b):
        m = jnp.mean(v, -1, keepdims=True)
        var = jnp.mean((v - m) ** 2, -1, keepdims=True)
        return (v - m) / jnp.sqrt(var + EPS) * g + b

    xn = ln(x, ln1g[0], ln1b[0])
    qkv = xn @ wqkv + bqkv[0]
    q, k, v = jnp.split(qkv, 3, axis=-1)

    def heads(t):  # (B,S,H) -> (B,NH,S,D)
        return t.reshape(B, S, NH, D).transpose(0, 2, 1, 3)

    q, k, v = heads(q), heads(k), heads(v)
    scores = jnp.einsum("bhqd,bhkd->bhqk", q, k) / math.sqrt(D)
    causal = jnp.tril(jnp.ones((S, S), bool))
    scores = jnp.where(causal, scores, NEG)
    p = jax.nn.softmax(scores, axis=-1)
    ctx = jnp.einsum("bhqk,bhkd->bhqd", p, v).transpose(0, 2, 1, 3).reshape(B, S, H)
    attn_out = ctx @ wo + bo[0]
    h1 = x + attn_out
    h1n = ln(h1, ln2g[0], ln2b[0])
    ff = _gelu_new(h1n @ wfc + bfc[0]) @ wpr + bpr[0]
    return h1 + ff, p


# ---------------- main ----------------
if __name__ == "__main__":
    key = jax.random.PRNGKey(0)
    ks = jax.random.split(key, 8)

    x = jax.random.normal(ks[0], (B, S, H), jnp.float32)

    init = lambda k, shape: (0.02 * jax.random.normal(k, shape)).astype(jnp.float32)
    params = (
        jnp.ones((1, H), jnp.float32),              # ln1 gamma
        jnp.zeros((1, H), jnp.float32),             # ln1 beta
        init(ks[1], (H, 3 * H)),                    # W_qkv
        jnp.zeros((1, 3 * H), jnp.float32),         # b_qkv
        init(ks[2], (H, H)),                        # W_o
        jnp.zeros((1, H), jnp.float32),             # b_o
        jnp.ones((1, H), jnp.float32),              # ln2 gamma
        jnp.zeros((1, H), jnp.float32),             # ln2 beta
        init(ks[3], (H, INNER)),                    # W_fc
        jnp.zeros((1, INNER), jnp.float32),         # b_fc
        init(ks[4], (INNER, H)),                    # W_proj
        jnp.zeros((1, H), jnp.float32),             # b_proj
    )

    y, aw = classic_block(x, params)
    jax.block_until_ready((y, aw))

    y_r, aw_r = classic_block_ref(x, params)
    assert y.shape == (B, S, H) and aw.shape == (B, NH, S, S)
    # approx=True softmax reciprocal -> slightly loosened tolerances
    assert jnp.allclose(y, y_r, atol=5e-3, rtol=5e-3), "hidden_states mismatch"
    assert jnp.allclose(aw, aw_r, atol=5e-3, rtol=5e-3), "att_weight mismatch"

    print("KERNEL_OK")
</pallas_src>

<mosaic_0001>
module attributes {stable_mosaic.version = 11 : i64} {
  func.func @classic_block_kernel(%arg0: memref<2x8x32xf32, #tpu.memory_space<vmem>>, %arg1: memref<1x32xf32, #tpu.memory_space<vmem>>, %arg2: memref<1x32xf32, #tpu.memory_space<vmem>>, %arg3: memref<24x32x8xf32, #tpu.memory_space<vmem>>, %arg4: memref<24x1x8xf32, #tpu.memory_space<vmem>>, %arg5: memref<8x8x32xf32, #tpu.memory_space<vmem>>, %arg6: memref<1x32xf32, #tpu.memory_space<vmem>>, %arg7: memref<1x32xf32, #tpu.memory_space<vmem>>, %arg8: memref<1x32xf32, #tpu.memory_space<vmem>>, %arg9: memref<2x32x128xf32, #tpu.memory_space<vmem>>, %arg10: memref<1x128xf32, #tpu.memory_space<vmem>>, %arg11: memref<2x128x32xf32, #tpu.memory_space<vmem>>, %arg12: memref<1x32xf32, #tpu.memory_space<vmem>>, %arg13: memref<2x8x32xf32, #tpu.memory_space<vmem>>, %arg14: memref<4x2x8x8xf32, #tpu.memory_space<vmem>>) attributes {dimension_semantics = [], scalar_prefetch = 0 : i64, scratch_operands = 0 : i64, tpu.core_type = #tpu.core_type<tc>} {
    %c0 = arith.constant 0 : index
    %c0_0 = arith.constant 0 : index
    %c0_1 = arith.constant 0 : index
    %0 = vector.load %arg0[%c0, %c0_0, %c0_1] : memref<2x8x32xf32, #tpu.memory_space<vmem>>, vector<2x8x32xf32>
    %c0_2 = arith.constant 0 : index
    %c0_3 = arith.constant 0 : index
    %1 = vector.load %arg1[%c0_2, %c0_3] : memref<1x32xf32, #tpu.memory_space<vmem>>, vector<1x32xf32>
    %c0_4 = arith.constant 0 : index
    %c0_5 = arith.constant 0 : index
    %2 = vector.load %arg2[%c0_4, %c0_5] : memref<1x32xf32, #tpu.memory_space<vmem>>, vector<1x32xf32>
    %cst = arith.constant dense<0.000000e+00> : vector<2x8xf32>
    %3 = vector.multi_reduction <add>, %0, %cst [2] : vector<2x8x32xf32> to vector<2x8xf32>
    %4 = vector.shape_cast %3 : vector<2x8xf32> to vector<2x8x1xf32>
    %cst_6 = arith.constant 3.200000e+01 : f32
    %5 = vector.broadcast %cst_6 : f32 to vector<2x8x1xf32>
    %6 = arith.divf %4, %5 : vector<2x8x1xf32>
    %7 = vector.broadcast %6 : vector<2x8x1xf32> to vector<2x8x32xf32>
    %8 = arith.subf %0, %7 : vector<2x8x32xf32>
    %9 = arith.mulf %8, %8 : vector<2x8x32xf32>
    %cst_7 = arith.constant dense<0.000000e+00> : vector<2x8xf32>
    %10 = vector.multi_reduction <add>, %9, %cst_7 [2] : vector<2x8x32xf32> to vector<2x8xf32>
    %11 = vector.shape_cast %10 : vector<2x8xf32> to vector<2x8x1xf32>
    %cst_8 = arith.constant 3.200000e+01 : f32
    %12 = vector.broadcast %cst_8 : f32 to vector<2x8x1xf32>
    %13 = arith.divf %11, %12 : vector<2x8x1xf32>
    %14 = vector.broadcast %6 : vector<2x8x1xf32> to vector<2x8x32xf32>
    %15 = arith.subf %0, %14 : vector<2x8x32xf32>
    %cst_9 = arith.constant 9.99999974E-6 : f32
    %16 = vector.broadcast %cst_9 : f32 to vector<2x8x1xf32>
    %17 = arith.addf %13, %16 : vector<2x8x1xf32>
    %18 = math.rsqrt %17 : vector<2x8x1xf32>
    %19 = vector.broadcast %18 : vector<2x8x1xf32> to vector<2x8x32xf32>
    %20 = arith.mulf %15, %19 : vector<2x8x32xf32>
    %21 = vector.shape_cast %1 : vector<1x32xf32> to vector<1x1x32xf32>
    %22 = vector.broadcast %21 : vector<1x1x32xf32> to vector<2x8x32xf32>
    %23 = arith.mulf %20, %22 : vector<2x8x32xf32>
    %24 = vector.shape_cast %2 : vector<1x32xf32> to vector<1x1x32xf32>
    %25 = vector.broadcast %24 : vector<1x1x32xf32> to vector<2x8x32xf32>
    %26 = arith.addf %23, %25 : vector<2x8x32xf32>
    %27 = vector.shape_cast %26 : vector<2x8x32xf32> to vector<1x2x8x32xf32>
    %28 = vector.broadcast %27 : vector<1x2x8x32xf32> to vector<12x2x8x32xf32>
    %29 = vector.shape_cast %28 : vector<12x2x8x32xf32> to vector<24x8x32xf32>
    %c0_10 = arith.constant 0 : index
    %c0_11 = arith.constant 0 : index
    %c0_12 = arith.constant 0 : index
    %30 = vector.load %arg3[%c0_10, %c0_11, %c0_12] : memref<24x32x8xf32, #tpu.memory_space<vmem>>, vector<24x32x8xf32>
    "tpu.trace_start"() <{level = 10 : i32, message = "zsh,zhd->zsd"}> : () -> ()
    %cst_13 = arith.constant dense<0.000000e+00> : vector<24x8x8xf32>
    %31 = tpu.matmul %29, %30, %cst_13 {dimension_numbers = #tpu.dot_dimension_numbers<[2], [1], [1], [2], [0, 0, 0, 1, 1, 2], [0], [0]>} : vector<24x8x32xf32>, vector<24x32x8xf32>, vector<24x8x8xf32> -> vector<24x8x8xf32>
    "tpu.trace_stop"() : () -> ()
    %c0_14 = arith.constant 0 : index
    %c0_15 = arith.constant 0 : index
    %c0_16 = arith.constant 0 : index
    %32 = vector.load %arg4[%c0_14, %c0_15, %c0_16] : memref<24x1x8xf32, #tpu.memory_space<vmem>>, vector<24x1x8xf32>
    %33 = vector.broadcast %32 : vector<24x1x8xf32> to vector<24x8x8xf32>
    %34 = arith.addf %31, %33 : vector<24x8x8xf32>
    %35 = vector.extract_strided_slice %34 {offsets = [0, 0, 0], sizes = [8, 8, 8], strides = [1, 1, 1]} : vector<24x8x8xf32> to vector<8x8x8xf32>
    %36 = vector.extract_strided_slice %34 {offsets = [8, 0, 0], sizes = [8, 8, 8], strides = [1, 1, 1]} : vector<24x8x8xf32> to vector<8x8x8xf32>
    %37 = vector.extract_strided_slice %34 {offsets = [16, 0, 0], sizes = [8, 8, 8], strides = [1, 1, 1]} : vector<24x8x8xf32> to vector<8x8x8xf32>
    "tpu.trace_start"() <{level = 10 : i32, message = "zqd,zkd->zqk"}> : () -> ()
    %cst_17 = arith.constant dense<0.000000e+00> : vector<8x8x8xf32>
    %38 = tpu.matmul %35, %36, %cst_17 {dimension_numbers = #tpu.dot_dimension_numbers<[2], [2], [1], [1], [0, 0, 0, 1, 1, 1], [0], [0]>} : vector<8x8x8xf32>, vector<8x8x8xf32>, vector<8x8x8xf32> -> vector<8x8x8xf32>
    "tpu.trace_stop"() : () -> ()
    %cst_18 = arith.constant 0.353553385 : f32
    %39 = vector.broadcast %cst_18 : f32 to vector<8x8x8xf32>
    %40 = arith.mulf %38, %39 : vector<8x8x8xf32>
    %41 = tpu.iota {dimensions = array<i32: 0>} : vector<8x8xi32>
    %42 = tpu.iota {dimensions = array<i32: 1>} : vector<8x8xi32>
    %43 = arith.cmpi sge, %41, %42 : vector<8x8xi32>
    %cst_19 = arith.constant -3.40282347E+38 : f32
    %44 = vector.shape_cast %43 : vector<8x8xi1> to vector<1x8x8xi1>
    %45 = vector.broadcast %44 : vector<1x8x8xi1> to vector<8x8x8xi1>
    %46 = vector.broadcast %cst_19 : f32 to vector<8x8x8xf32>
    %47 = arith.select %45, %40, %46 : vector<8x8x8xi1>, vector<8x8x8xf32>
    %cst_20 = arith.constant dense<0xFF800000> : vector<8x8xf32>
    %48 = vector.multi_reduction <maximumf>, %47, %cst_20 [2] : vector<8x8x8xf32> to vector<8x8xf32>
    %49 = vector.shape_cast %48 : vector<8x8xf32> to vector<8x8x1xf32>
    %50 = vector.broadcast %49 : vector<8x8x1xf32> to vector<8x8x8xf32>
    %51 = arith.subf %47, %50 : vector<8x8x8xf32>
    %52 = math.exp %51 : vector<8x8x8xf32>
    %cst_21 = arith.constant dense<0.000000e+00> : vector<8x8xf32>
    %53 = vector.multi_reduction <add>, %52, %cst_21 [2] : vector<8x8x8xf32> to vector<8x8xf32>
    %54 = vector.shape_cast %53 : vector<8x8xf32> to vector<8x8x1xf32>
    %55 = tpu.reciprocal %54 {approx = true} : vector<8x8x1xf32> -> vector<8x8x1xf32>
    %56 = vector.broadcast %55 : vector<8x8x1xf32> to vector<8x8x8xf32>
    %57 = arith.mulf %52, %56 : vector<8x8x8xf32>
    %58 = vector.shape_cast %57 : vector<8x8x8xf32> to vector<4x2x8x8xf32>
    %c0_22 = arith.constant 0 : index
    %c0_23 = arith.constant 0 : index
    %c0_24 = arith.constant 0 : index
    %c0_25 = arith.constant 0 : index
    %59 = vector.load %arg14[%c0_22, %c0_23, %c0_24, %c0_25] : memref<4x2x8x8xf32, #tpu.memory_space<vmem>>, vector<4x2x8x8xf32>
    tpu.vector_store %arg14[%c0_22, %c0_23, %c0_24, %c0_25], %58 {strides = array<i32>} : memref<4x2x8x8xf32, #tpu.memory_space<vmem>>, vector<4x2x8x8xf32>,
    "tpu.trace_start"() <{level = 10 : i32, message = "zqk,zkd->zqd"}> : () -> ()
    %cst_26 = arith.constant dense<0.000000e+00> : vector<8x8x8xf32>
    %60 = tpu.matmul %57, %37, %cst_26 {dimension_numbers = #tpu.dot_dimension_numbers<[2], [1], [1], [2], [0, 0, 0, 1, 1, 2], [0], [0]>} : vector<8x8x8xf32>, vector<8x8x8xf32>, vector<8x8x8xf32> -> vector<8x8x8xf32>
    "tpu.trace_stop"() : () -> ()
    %c0_27 = arith.constant 0 : index
    %c0_28 = arith.constant 0 : index
    %c0_29 = arith.constant 0 : index
    %61 = vector.load %arg5[%c0_27, %c0_28, %c0_29] : memref<8x8x32xf32, #tpu.memory_space<vmem>>, vector<8x8x32xf32>
    "tpu.trace_start"() <{level = 10 : i32, message = "zsd,zdh->zsh"}> : () -> ()
    %cst_30 = arith.constant dense<0.000000e+00> : vector<8x8x32xf32>
    %62 = tpu.matmul %60, %61, %cst_30 {dimension_numbers = #tpu.dot_dimension_numbers<[2], [1], [1], [2], [0, 0, 0, 1, 1, 2], [0], [0]>} : vector<8x8x8xf32>, vector<8x8x32xf32>, vector<8x8x32xf32> -> vector<8x8x32xf32>
    "tpu.trace_stop"() : () -> ()
    %63 = vector.shape_cast %62 : vector<8x8x32xf32> to vector<4x2x8x32xf32>
    %cst_31 = arith.constant dense<0.000000e+00> : vector<2x8x32xf32>
    %64 = vector.multi_reduction <add>, %63, %cst_31 [0] : vector<4x2x8x32xf32> to vector<2x8x32xf32>
    %c0_32 = arith.constant 0 : index
    %c0_33 = arith.constant 0 : index
    %65 = vector.load %arg6[%c0_32, %c0_33] : memref<1x32xf32, #tpu.memory_space<vmem>>, vector<1x32xf32>
    %66 = vector.shape_cast %65 : vector<1x32xf32> to vector<1x1x32xf32>
    %67 = vector.broadcast %66 : vector<1x1x32xf32> to vector<2x8x32xf32>
    %68 = arith.addf %64, %67 : vector<2x8x32xf32>
    %69 = arith.addf %0, %68 : vector<2x8x32xf32>
    %c0_34 = arith.constant 0 : index
    %c0_35 = arith.constant 0 : index
    %70 = vector.load %arg7[%c0_34, %c0_35] : memref<1x32xf32, #tpu.memory_space<vmem>>, vector<1x32xf32>
    %c0_36 = arith.constant 0 : index
    %c0_37 = arith.constant 0 : index
    %71 = vector.load %arg8[%c0_36, %c0_37] : memref<1x32xf32, #tpu.memory_space<vmem>>, vector<1x32xf32>
    %cst_38 = arith.constant dense<0.000000e+00> : vector<2x8xf32>
    %72 = vector.multi_reduction <add>, %69, %cst_38 [2] : vector<2x8x32xf32> to vector<2x8xf32>
    %73 = vector.shape_cast %72 : vector<2x8xf32> to vector<2x8x1xf32>
    %cst_39 = arith.constant 3.200000e+01 : f32
    %74 = vector.broadcast %cst_39 : f32 to vector<2x8x1xf32>
    %75 = arith.divf %73, %74 : vector<2x8x1xf32>
    %76 = vector.broadcast %75 : vector<2x8x1xf32> to vector<2x8x32xf32>
    %77 = arith.subf %69, %76 : vector<2x8x32xf32>
    %78 = arith.mulf %77, %77 : vector<2x8x32xf32>
    %cst_40 = arith.constant dense<0.000000e+00> : vector<2x8xf32>
    %79 = vector.multi_reduction <add>, %78, %cst_40 [2] : vector<2x8x32xf32> to vector<2x8xf32>
    %80 = vector.shape_cast %79 : vector<2x8xf32> to vector<2x8x1xf32>
    %cst_41 = arith.constant 3.200000e+01 : f32
    %81 = vector.broadcast %cst_41 : f32 to vector<2x8x1xf32>
    %82 = arith.divf %80, %81 : vector<2x8x1xf32>
    %83 = vector.broadcast %75 : vector<2x8x1xf32> to vector<2x8x32xf32>
    %84 = arith.subf %69, %83 : vector<2x8x32xf32>
    %cst_42 = arith.constant 9.99999974E-6 : f32
    %85 = vector.broadcast %cst_42 : f32 to vector<2x8x1xf32>
    %86 = arith.addf %82, %85 : vector<2x8x1xf32>
    %87 = math.rsqrt %86 : vector<2x8x1xf32>
    %88 = vector.broadcast %87 : vector<2x8x1xf32> to vector<2x8x32xf32>
    %89 = arith.mulf %84, %88 : vector<2x8x32xf32>
    %90 = vector.shape_cast %70 : vector<1x32xf32> to vector<1x1x32xf32>
    %91 = vector.broadcast %90 : vector<1x1x32xf32> to vector<2x8x32xf32>
    %92 = arith.mulf %89, %91 : vector<2x8x32xf32>
    %93 = vector.shape_cast %71 : vector<1x32xf32> to vector<1x1x32xf32>
    %94 = vector.broadcast %93 : vector<1x1x32xf32> to vector<2x8x32xf32>
    %95 = arith.addf %92, %94 : vector<2x8x32xf32>
    %c0_43 = arith.constant 0 : index
    %c0_44 = arith.constant 0 : index
    %c0_45 = arith.constant 0 : index
    %96 = vector.load %arg9[%c0_43, %c0_44, %c0_45] : memref<2x32x128xf32, #tpu.memory_space<vmem>>, vector<2x32x128xf32>
    "tpu.trace_start"() <{level = 10 : i32, message = "bsh,bhi->bsi"}> : () -> ()
    %cst_46 = arith.constant dense<0.000000e+00> : vector<2x8x128xf32>
    %97 = tpu.matmul %95, %96, %cst_46 {dimension_numbers = #tpu.dot_dimension_numbers<[2], [1], [1], [2], [0, 0, 0, 1, 1, 2], [0], [0]>} : vector<2x8x32xf32>, vector<2x32x128xf32>, vector<2x8x128xf32> -> vector<2x8x128xf32>
    "tpu.trace_stop"() : () -> ()
    %c0_47 = arith.constant 0 : index
    %c0_48 = arith.constant 0 : index
    %98 = vector.load %arg10[%c0_47, %c0_48] : memref<1x128xf32, #tpu.memory_space<vmem>>, vector<1x128xf32>
    %99 = vector.shape_cast %98 : vector<1x128xf32> to vector<1x1x128xf32>
    %100 = vector.broadcast %99 : vector<1x1x128xf32> to vector<2x8x128xf32>
    %101 = arith.addf %97, %100 : vector<2x8x128xf32>
    %cst_49 = arith.constant 5.000000e-01 : f32
    %102 = vector.broadcast %cst_49 : f32 to vector<2x8x128xf32>
    %103 = arith.mulf %102, %101 : vector<2x8x128xf32>
    %cst_50 = arith.constant 4.471500e-02 : f32
    %104 = vector.broadcast %cst_50 : f32 to vector<2x8x128xf32>
    %105 = arith.mulf %104, %101 : vector<2x8x128xf32>
    %106 = arith.mulf %105, %101 : vector<2x8x128xf32>
    %107 = arith.mulf %106, %101 : vector<2x8x128xf32>
    %108 = arith.addf %101, %107 : vector<2x8x128xf32>
    %cst_51 = arith.constant 0.797884583 : f32
    %109 = vector.broadcast %cst_51 : f32 to vector<2x8x128xf32>
    %110 = arith.mulf %109, %108 : vector<2x8x128xf32>
    %111 = math.tanh %110 : vector<2x8x128xf32>
    %cst_52 = arith.constant 1.000000e+00 : f32
    %112 = vector.broadcast %cst_52 : f32 to vector<2x8x128xf32>
    %113 = arith.addf %112, %111 : vector<2x8x128xf32>
    %114 = arith.mulf %103, %113 : vector<2x8x128xf32>
    %c0_53 = arith.constant 0 : index
    %c0_54 = arith.constant 0 : index
    %c0_55 = arith.constant 0 : index
    %115 = vector.load %arg11[%c0_53, %c0_54, %c0_55] : memref<2x128x32xf32, #tpu.memory_space<vmem>>, vector<2x128x32xf32>
    "tpu.trace_start"() <{level = 10 : i32, message = "bsi,bih->bsh"}> : () -> ()
    %cst_56 = arith.constant dense<0.000000e+00> : vector<2x8x32xf32>
    %116 = tpu.matmul %114, %115, %cst_56 {dimension_numbers = #tpu.dot_dimension_numbers<[2], [1], [1], [2], [0, 0, 0, 1, 1, 2], [0], [0]>} : vector<2x8x128xf32>, vector<2x128x32xf32>, vector<2x8x32xf32> -> vector<2x8x32xf32>
    "tpu.trace_stop"() : () -> ()
    %c0_57 = arith.constant 0 : index
    %c0_58 = arith.constant 0 : index
    %117 = vector.load %arg12[%c0_57, %c0_58] : memref<1x32xf32, #tpu.memory_space<vmem>>, vector<1x32xf32>
    %118 = vector.shape_cast %117 : vector<1x32xf32> to vector<1x1x32xf32>
    %119 = vector.broadcast %118 : vector<1x1x32xf32> to vector<2x8x32xf32>
    %120 = arith.addf %116, %119 : vector<2x8x32xf32>
    %121 = arith.addf %69, %120 : vector<2x8x32xf32>
    %c0_59 = arith.constant 0 : index
    %c0_60 = arith.constant 0 : index
    %c0_61 = arith.constant 0 : index
    %122 = vector.load %arg13[%c0_59, %c0_60, %c0_61] : memref<2x8x32xf32, #tpu.memory_space<vmem>>, vector<2x8x32xf32>
    tpu.vector_store %arg13[%c0_59, %c0_60, %c0_61], %121 {strides = array<i32>} : memref<2x8x32xf32, #tpu.memory_space<vmem>>, vector<2x8x32xf32>,
    return
  }
}

</mosaic_0001>

<bundles_post_ra>
// kernel: classic_block.1
= control target key start
LH: loop header
LB: loop body
LE: loop exit
PB: predicated region body
PF: predicated region fallthrough
CT: control target
= control target key end

     0   :  { %vm51_vm0 = vcmask 261120   ;;  %s2749_s0 = inlined_call_operand.vmem [shape: f32[2,8,32], index: 0, kind: input, shape index: {}]   ;;  %s2750_s1 = inlined_call_operand.vmem [shape: f32[1,32], index: 1, kind: input, shape index: {}]   ;;  %s2751_s2 = inlined_call_operand.vmem [shape: f32[1,32], index: 2, kind: input, shape index: {}]   ;;  %s2752_s3 = inlined_call_operand.vmem [shape: f32[24,32,8], index: 3, kind: input, shape index: {}]   ;;  %s2753_s4 = inlined_call_operand.vmem [shape: f32[24,1,8], index: 4, kind: input, shape index: {}]   ;;  %s2754_s5 = inlined_call_operand.vmem [shape: f32[8,8,32], index: 5, kind: input, shape index: {}]   ;;  %s2755_s6 = inlined_call_operand.vmem [shape: f32[1,32], index: 6, kind: input, shape index: {}]   ;;  %s2756_s7 = inlined_call_operand.vmem [shape: f32[1,32], index: 7, kind: input, shape index: {}]   ;;  %s2757_s8 = inlined_call_operand.vmem [shape: f32[1,32], index: 8, kind: input, shape index: {}]   ;;  %s2758_s9 = inlined_call_operand.vmem [shape: f32[2,32,128], index: 9, kind: input, shape index: {}]   ;;  %s2759_s10 = inlined_call_operand.vmem [shape: f32[1,128], index: 10, kind: input, shape index: {}]   ;;  %s2760_s11 = inlined_call_operand.vmem [shape: f32[2,128,32], index: 11, kind: input, shape index: {}]   ;;  %s2761_s12 = inlined_call_operand.vmem [shape: f32[1,32], index: 12, kind: input, shape index: {}]   ;;  %s2762_s13 = inlined_call_operand.hbm [shape: f32[2,8,32], index: 13, kind: output, shape index: {0}]   ;;  %s2763_s14 = inlined_call_operand.vmem [shape: f32[4,2,8,8], index: 14, kind: output, shape index: {1}]  }
   0x1   :  { %v47_v0 = vld [vmem:[%s2749_s0] sm:$0xff]  ;;  %v48_v1 = vld [vmem:[%s2749_s0 + $0x8] sm:$0xff] }
   0x2   :  { %v52_v2 = vsel %vm51_vm0, %v47_v0, 0.0  ;;  %v55_v3 = vsel %vm51_vm0, %v48_v1, 0.0 }
   0x3   :  { %53 = vadd.xlane.f32.xlu0 %v52_v2 }
   0xb   :  { %56 = vadd.xlane.f32.xlu0 %v55_v3 }
   0xc   :  { %20 = vsyncpa [#allocation3], 0  ;;  %v1918_v4 = vmov 32.0   ;;  %v116_v21 = vld [vmem:[%s2752_s3 + $0x18] sm:$0xff]  ;;  %v115_v23 = vld [vmem:[%s2752_s3 + $0x10] sm:$0xff]  ;;  %vm791_vm8 = vcmask 64512  }
   0xd   :  { %1844 = vrcp.f32 %v1918_v4  ;;  %v140_v22 = vld [vmem:[%s2752_s3 + $0xd8] sm:$0xff]  ;;  %320 = vmatpush.msra.mxu0 %v116_v21  ;;  %v139_v24 = vld [vmem:[%s2752_s3 + $0xd0] sm:$0xff]  ;;  %v114_v25 = vld [vmem:[%s2752_s3 + $0x8] sm:$0xff]  ;;  %s1919_s30 = smov [#allocation2]   ;;  %s1735_s16 = sshll.u32 %s2762_s13, 4  ;;  %s1736_s16 = int_to_ptr.hbm [resolvable:$true] %s1735_s16 }
   0xe   :  { %443 = vmatpush.msra.mxu2 %v140_v22  ;;  %v138_v26 = vld [vmem:[%s2752_s3 + $0xc8] sm:$0xff]  ;;  %v113_v27 = vld [vmem:[%s2752_s3] sm:$0xff]  ;;  %v120_v29 = vld [vmem:[%s2752_s3 + $0x38] sm:$0xff]  ;;  %s1921_s17 = smov 8  }
   0xf   :  { %321 = vmatpush.msra.mxu0 %v115_v23  ;;  %v137_v28 = vld [vmem:[%s2752_s3 + $0xc0] sm:$0xff]  ;;  %v124_v30 = vld [vmem:[%s2752_s3 + $0x58] sm:$0xff]  ;;  %343 = vmatpush.msra.mxu1 %v120_v29  ;;  %v119_v33 = vld [vmem:[%s2752_s3 + $0x30] sm:$0xff] }
  0x10   :  { %444 = vmatpush.msra.mxu2 %v139_v24  ;;  %v144_v31 = vld [vmem:[%s2752_s3 + $0xf8] sm:$0xff]  ;;  %v123_v34 = vld [vmem:[%s2752_s3 + $0x50] sm:$0xff]  ;;  %v118_v39 = vld [vmem:[%s2752_s3 + $0x28] sm:$0xff] }
  0x11   :  { %322 = vmatpush.msra.mxu0 %v114_v25  ;;  %v156_v32 = vld [vmem:[%s2752_s3 + $0x158] sm:$0xff]  ;;  %463 = vmatpush.msra.mxu3 %v144_v31  ;;  %v143_v35 = vld [vmem:[%s2752_s3 + $0xf0] sm:$0xff]  ;;  %v122_v40 = vld [vmem:[%s2752_s3 + $0x48] sm:$0xff] }
  0x12   :  { %445 = vmatpush.msra.mxu2 %v138_v26  ;;  %344 = vmatpush.msra.mxu1 %v119_v33  ;;  %v155_v37 = vld [vmem:[%s2752_s3 + $0x150] sm:$0xff]  ;;  %v142_v41 = vld [vmem:[%s2752_s3 + $0xe8] sm:$0xff]  ;;  %v117_v44 = vld [vmem:[%s2752_s3 + $0x20] sm:$0xff] }
  0x13   :  { %v1845_v5 = vpop.eup %1844  ;;  %323 = vmatpush.msra.mxu0 %v113_v27  ;;  %464 = vmatpush.msra.mxu3 %v143_v35  ;;  %v154_v42 = vld [vmem:[%s2752_s3 + $0x148] sm:$0xff]  ;;  %v121_v45 = vld [vmem:[%s2752_s3 + $0x40] sm:$0xff]  ;;  %v128_v48 = vld [vmem:[%s2752_s3 + $0x78] sm:$0xff] }
  0x14   :  { %v59_v6 = vmul.f32 32.0, %v1845_v5  ;;  %vm63_vm1 = vweird.f32 %v1845_v5  ;;  %446 = vmatpush.msra.mxu2 %v137_v28  ;;  %345 = vmatpush.msra.mxu1 %v118_v39  ;;  %v141_v46 = vld [vmem:[%s2752_s3 + $0xe0] sm:$0xff]  ;;  %v160_v49 = vld [vmem:[%s2752_s3 + $0x178] sm:$0xff]  ;;  %v127_v50 = vld [vmem:[%s2752_s3 + $0x70] sm:$0xff] }
  0x15   :  { %363 = vmatpush.msrb.mxu0 %v124_v30  ;;  %465 = vmatpush.msra.mxu3 %v142_v41  ;;  %v153_v47 = vld [vmem:[%s2752_s3 + $0x140] sm:$0xff]  ;;  %v159_v52 = vld [vmem:[%s2752_s3 + $0x170] sm:$0xff]  ;;  %v126_v53 = vld [vmem:[%s2752_s3 + $0x68] sm:$0xff] }
  0x16   :  { %v60_v7 = vsub.f32 1.0, %v59_v6  ;;  %523 = vmatpush.msrb.mxu2 %v156_v32  ;;  %346 = vmatpush.msra.mxu1 %v117_v44  ;;  %v158_v55 = vld [vmem:[%s2752_s3 + $0x168] sm:$0xff]  ;;  %v125_v56 = vld [vmem:[%s2752_s3 + $0x60] sm:$0xff]  ;;  %v136_v26 = vld [vmem:[%s2752_s3 + $0xb8] sm:$0xff] }
  0x17   :  { %364 = vmatpush.msrb.mxu0 %v123_v34  ;;  %466 = vmatpush.msra.mxu3 %v141_v46  ;;  %v157_v57 = vld [vmem:[%s2752_s3 + $0x160] sm:$0xff]  ;;  %v130_v21 = vld [vmem:[%s2752_s3 + $0x88] sm:$0xff]  ;;  %v148_v27 = vld [vmem:[%s2752_s3 + $0x118] sm:$0xff] }
  0x18   :  { %v61_v8 = vmul.f32 %v1845_v5, %v60_v7  ;;  %524 = vmatpush.msrb.mxu2 %v155_v37  ;;  %383 = vmatpush.msrb.mxu1 %v128_v48  ;;  %v1813_v3 = vld [vmem:[%s2750_s1] ss:$0 sm:$0xff]  ;;  %v170_v22 = vld [vmem:[%s2752_s3 + $0x1c8] sm:$0xff]  ;;  %v176_v28 = vld [vmem:[%s2752_s3 + $0x1f8] sm:$0xff] }
  0x19   :  { %365 = vmatpush.msrb.mxu0 %v122_v40  ;;  %543 = vmatpush.msrb.mxu3 %v160_v49  ;;  %v1814_v6 = vld [vmem:[%s2751_s2] ss:$0 sm:$0xff]  ;;  %v188_v29 = vld [vmem:[%s2752_s3 + $0x258] sm:$0xff]  ;;  %v135_v30 = vld [vmem:[%s2752_s3 + $0xb0] sm:$0xff] }
  0x1a   :  { %v62_v9 = vadd.f32 %v1845_v5, %v61_v8  ;;  %525 = vmatpush.msrb.mxu2 %v154_v42  ;;  %384 = vmatpush.msrb.mxu1 %v127_v50  ;;  %v129_v24 = vld [vmem:[%s2752_s3 + $0x80] sm:$0xff]  ;;  %v147_v31 = vld [vmem:[%s2752_s3 + $0x110] sm:$0xff]  ;;  %v134_v34 = vld [vmem:[%s2752_s3 + $0xa8] sm:$0xff] }
  0x1b   :  { %366 = vmatpush.msrb.mxu0 %v121_v45  ;;  %544 = vmatpush.msrb.mxu3 %v159_v52  ;;  %v169_v25 = vld [vmem:[%s2752_s3 + $0x1c0] sm:$0xff]  ;;  %v175_v32 = vld [vmem:[%s2752_s3 + $0x1f0] sm:$0xff]  ;;  %v146_v35 = vld [vmem:[%s2752_s3 + $0x108] sm:$0xff] }
  0x1c   :  { %v2005_v10 = vsel %vm63_vm1, %v1845_v5, %v62_v9  ;;  %526 = vmatpush.msrb.mxu2 %v153_v47  ;;  %385 = vmatpush.msrb.mxu1 %v126_v53  ;;  %v187_v33 = vld [vmem:[%s2752_s3 + $0x250] sm:$0xff]  ;;  %v186_v37 = vld [vmem:[%s2752_s3 + $0x248] sm:$0xff]  ;;  %v145_v39 = vld [vmem:[%s2752_s3 + $0x100] sm:$0xff] }
  0x1d   :  { %545 = vmatpush.msrb.mxu3 %v158_v55  ;;  %v173_v40 = vld [vmem:[%s2752_s3 + $0x1e0] sm:$0xff]  ;;  %v152_v42 = vld [vmem:[%s2752_s3 + $0x138] sm:$0xff]  ;;  %v151_v46 = vld [vmem:[%s2752_s3 + $0x130] sm:$0xff] }
  0x1e   :  { %386 = vmatpush.msrb.mxu1 %v125_v56  ;;  %v185_v41 = vld [vmem:[%s2752_s3 + $0x240] sm:$0xff]  ;;  %v192_v44 = vld [vmem:[%s2752_s3 + $0x278] sm:$0xff]  ;;  %v163_v47 = vld [vmem:[%s2752_s3 + $0x190] sm:$0xff] }
  0x1f   :  { %546 = vmatpush.msrb.mxu3 %v157_v57  ;;  %v204_v45 = vld [vmem:[%s2752_s3 + $0x2d8] sm:$0xff]  ;;  %v191_v48 = vld [vmem:[%s2752_s3 + $0x270] sm:$0xff]  ;;  %v150_v50 = vld [vmem:[%s2752_s3 + $0x128] sm:$0xff] }
  0x20   :  { %v203_v49 = vld [vmem:[%s2752_s3 + $0x2d0] sm:$0xff]  ;;  %v190_v52 = vld [vmem:[%s2752_s3 + $0x268] sm:$0xff]  ;;  %v161_v55 = vld [vmem:[%s2752_s3 + $0x180] sm:$0xff] }
  0x21   :  { %v202_v53 = vld [vmem:[%s2752_s3 + $0x2c8] sm:$0xff]  ;;  %v189_v56 = vld [vmem:[%s2752_s3 + $0x260] sm:$0xff] }
  0x22   :  { %v201_v57 = vld [vmem:[%s2752_s3 + $0x2c0] sm:$0xff] }
  0x76   :  { %v54_v11 = vpop.xlane.xlu0 %53 }
  0x77   :  { %v65_v12 = vmul.f32 %v2005_v10, %v54_v11 }
  0x79   :  { %v2008_v13 = vsub.f32 %v47_v0, %v65_v12 }
  0x7b   :  { %v69_v14 = vmul.f32 %v2008_v13, %v2008_v13 }
  0x7d   :  { %v71_v15 = vsel %vm51_vm0, %v69_v14, 0.0  ;;  %v132_v14 = vld [vmem:[%s2752_s3 + $0x98] sm:$0xff] }
  0x7e   :  { %72 = vadd.xlane.f32.xlu1 %v71_v15  ;;  %v57_v16 = vpop.xlane.xlu0 %56  ;;  %v172_v15 = vld [vmem:[%s2752_s3 + $0x1d8] sm:$0xff] }
  0x7f   :  { %v66_v17 = vmul.f32 %v2005_v10, %v57_v16 }
  0x81   :  { %v2014_v18 = vsub.f32 %v48_v1, %v66_v17  ;;  %v171_v17 = vld [vmem:[%s2752_s3 + $0x1d0] sm:$0xff] }
  0x83   :  { %v70_v19 = vmul.f32 %v2014_v18, %v2014_v18 }
  0x85   :  { %v74_v20 = vsel %vm51_vm0, %v70_v19, 0.0 }
  0x86   :  { %75 = vadd.xlane.f32.xlu1 %v74_v20 }
  0xf1   :  { %v73_v36 = vpop.xlane.xlu1 %72 }
  0xf2   :  { %v77_v38 = vmul.f32 %v73_v36, %v2005_v10  ;;  %v174_v36 = vld [vmem:[%s2752_s3 + $0x1e8] sm:$0xff] }
  0xf4   :  { %v79_v43 = vadd.f32 1e-05, %v77_v38  ;;  %v133_v38 = vld [vmem:[%s2752_s3 + $0xa0] sm:$0xff] }
  0xf6   :  { %1846 = vrsqrt.f32 %v79_v43  ;;  %vm87_vm3 = vweird.f32 %v79_v43 }
  0xf9   :  { %v76_v51 = vpop.xlane.xlu1 %75 }
  0xfa   :  { %v78_v54 = vmul.f32 %v76_v51, %v2005_v10  ;;  %v162_v51 = vld [vmem:[%s2752_s3 + $0x188] sm:$0xff] }
  0xfc   :  { %v1847_v58 = vpop.eup %1846  ;;  %v80_v59 = vadd.f32 1e-05, %v78_v54  ;;  %v149_v54 = vld [vmem:[%s2752_s3 + $0x120] sm:$0xff] }
  0xfd   :  { %v82_v60 = vmul.f32 %v1847_v58, %v79_v43  ;;  %vm88_vm2 = vweird.f32 %v1847_v58  ;;  %v164_v43 = vld [vmem:[%s2752_s3 + $0x198] sm:$0xff] }
  0xfe   :  { %1848 = vrsqrt.f32 %v80_v59  ;;  %vm89_vm4 = vmor %vm87_vm3, %vm88_vm2  ;;  %vm97_vm6 = vweird.f32 %v80_v59 }
  0xff   :  { %v83_v61 = vmul.f32 %v1847_v58, %v82_v60  ;;  %v208_v60 = vld [vmem:[%s2752_s3 + $0x2f8] sm:$0xff] }
 0x101   :  { %v84_v62 = vmul.f32 0.5, %v83_v61  ;;  %v167_v61 = vld [vmem:[%s2752_s3 + $0x1b0] sm:$0xff] }
 0x103   :  { %v85_v63 = vsub.f32 1.5, %v84_v62  ;;  %v179_v62 = vld [vmem:[%s2752_s3 + $0x210] sm:$0xff] }
 0x104   :  { %v1849_v0 = vpop.eup %1848 }
 0x105   :  { %v86_v1 = vmul.f32 %v1847_v58, %v85_v63  ;;  %v92_v2 = vmul.f32 %v1849_v0, %v80_v59  ;;  %vm98_vm5 = vweird.f32 %v1849_v0  ;;  %v180_v59 = vld [vmem:[%s2752_s3 + $0x218] sm:$0xff]  ;;  %v207_v63 = vld [vmem:[%s2752_s3 + $0x2f0] sm:$0xff] }
 0x106   :  { %vm99_vm7 = vmor %vm97_vm6, %vm98_vm5 }
 0x107   :  { %v90_v4 = vsel %vm89_vm4, %v1847_v58, %v86_v1  ;;  %v93_v5 = vmul.f32 %v1849_v0, %v92_v2  ;;  %v168_v58 = vld [vmem:[%s2752_s3 + $0x1b8] sm:$0xff]  ;;  %v178_v1 = vld [vmem:[%s2752_s3 + $0x208] sm:$0xff] }
 0x108   :  { %v101_v7 = vmul.f32 %v90_v4, %v2008_v13  ;;  %v131_v13 = vld [vmem:[%s2752_s3 + $0x90] sm:$0xff]  ;;  %v206_v2 = vld [vmem:[%s2752_s3 + $0x2e8] sm:$0xff]  ;;  %v177_v4 = vld [vmem:[%s2752_s3 + $0x200] sm:$0xff] }
 0x109   :  { %v94_v8 = vmul.f32 0.5, %v93_v5  ;;  %v205_v5 = vld [vmem:[%s2752_s3 + $0x2e0] sm:$0xff] }
 0x10a   :  { %v106_v9 = vmul.f32 %v1813_v3, %v101_v7  ;;  %v196_v7 = vld [vmem:[%s2752_s3 + $0x298] sm:$0xff] }
 0x10b   :  { %v95_v11 = vsub.f32 1.5, %v94_v8  ;;  %v183_v8 = vld [vmem:[%s2752_s3 + $0x230] sm:$0xff] }
 0x10c   :  { %v2124_v12 = vadd.f32 %v1814_v6, %v106_v9  ;;  %v195_v9 = vld [vmem:[%s2752_s3 + $0x290] sm:$0xff] }
 0x10d   :  { %v96_v16 = vmul.f32 %v1849_v0, %v95_v11  ;;  %v182_v11 = vld [vmem:[%s2752_s3 + $0x228] sm:$0xff] }
 0x10e   :  { %1751 = vmatmul.msk.f32.vlgmr.msra.gmra.mxu0 %vm51_vm0, %v2124_v12  ;;  %1757 = vmatmul.msk.f32.vlgmr.msra.gmra.mxu2 %vm51_vm0, %v2124_v12 }
 0x10f   :  { %v100_v19 = vsel %vm99_vm7, %v1849_v0, %v96_v16  ;;  %403 = vmatpush.msra.mxu0 %v132_v14  ;;  %603 = vmatpush.msra.mxu2 %v172_v15  ;;  %v166_v0 = vld [vmem:[%s2752_s3 + $0x1a8] sm:$0xff]  ;;  %v181_v15 = vld [vmem:[%s2752_s3 + $0x220] sm:$0xff] }
 0x110   :  { %v102_v20 = vmul.f32 %v100_v19, %v2014_v18  ;;  %v194_v14 = vld [vmem:[%s2752_s3 + $0x288] sm:$0xff]  ;;  %v193_v16 = vld [vmem:[%s2752_s3 + $0x280] sm:$0xff] }
 0x111   :  { %404 = vmatpush.msra.mxu0 %v131_v13  ;;  %604 = vmatpush.msra.mxu2 %v171_v17  ;;  %v200_v13 = vld [vmem:[%s2752_s3 + $0x2b8] sm:$0xff]  ;;  %v199_v17 = vld [vmem:[%s2752_s3 + $0x2b0] sm:$0xff]  ;;  %v198_v19 = vld [vmem:[%s2752_s3 + $0x2a8] sm:$0xff] }
 0x112   :  { %v107_v23 = vmul.f32 %v1813_v3, %v102_v20  ;;  %v165_v3 = vld [vmem:[%s2752_s3 + $0x1a0] sm:$0xff] }
 0x113   :  { %405 = vmatpush.msra.mxu0 %v130_v21  ;;  %605 = vmatpush.msra.mxu2 %v170_v22  ;;  %v197_v20 = vld [vmem:[%s2752_s3 + $0x2a0] sm:$0xff] }
 0x114   :  { %v2155_v18 = vadd.f32 %v1814_v6, %v107_v23  ;;  %v184_v6 = vld [vmem:[%s2752_s3 + $0x238] sm:$0xff] }
 0x115   :  { %406 = vmatpush.msra.mxu0 %v129_v24  ;;  %606 = vmatpush.msra.mxu2 %v169_v25  ;;  %v1818_v25 = vld [vmem:[%s2753_s4 + $0x2] ss:$0 sm:$0xff] }
 0x116   :  { %1752 = vmatmul.msk.f32.vlgmr.msra.gmra.mxu1 %vm51_vm0, %v2155_v18  ;;  %1753 = vmatmul.msk.f32.vlgmr.msrb.gmra.mxu0 %vm51_vm0, %v2124_v12 }
 0x117   :  { %1758 = vmatmul.msk.f32.vlgmr.msra.gmra.mxu3 %vm51_vm0, %v2155_v18  ;;  %1761 = vmatmul.msk.f32.vlgmr.msrb.gmra.mxu2 %vm51_vm0, %v2124_v12 }
 0x118   :  { %423 = vmatpush.msra.mxu1 %v136_v26  ;;  %483 = vmatpush.msrb.mxu0 %v148_v27 }
 0x119   :  { %623 = vmatpush.msra.mxu3 %v176_v28  ;;  %683 = vmatpush.msrb.mxu2 %v188_v29 }
 0x11a   :  { %424 = vmatpush.msra.mxu1 %v135_v30  ;;  %484 = vmatpush.msrb.mxu0 %v147_v31  ;;  %v1823_v31 = vld [vmem:[%s2753_s4 + $0xb] ss:$0 sm:$0xff] }
 0x11b   :  { %624 = vmatpush.msra.mxu3 %v175_v32  ;;  %684 = vmatpush.msrb.mxu2 %v187_v33  ;;  %v1824_v32 = vld [vmem:[%s2753_s4 + $0xe] ss:$0 sm:$0xff]  ;;  %v1826_v33 = vld [vmem:[%s2753_s4 + $0x8] ss:$0 sm:$0xff] }
 0x11c   :  { %425 = vmatpush.msra.mxu1 %v134_v34  ;;  %485 = vmatpush.msrb.mxu0 %v146_v35  ;;  %v1816_v34 = vld [vmem:[%s2753_s4 + $0x6] ss:$0 sm:$0xff]  ;;  %v1821_v35 = vld [vmem:[%s2753_s4 + $0x3] ss:$0 sm:$0xff] }
 0x11d   :  { %625 = vmatpush.msra.mxu3 %v174_v36  ;;  %685 = vmatpush.msrb.mxu2 %v186_v37 }
 0x11e   :  { %1754 = vmatmul.msk.f32.vlgmr.msrb.gmra.mxu1 %vm51_vm0, %v2155_v18  ;;  %1755 = vmatmul.msk.f32.vlgmr.msra.gmra.mxu0 %vm51_vm0, %v2124_v12 }
 0x11f   :  { %1762 = vmatmul.msk.f32.vlgmr.msrb.gmra.mxu3 %vm51_vm0, %v2155_v18  ;;  %1765 = vmatmul.msk.f32.vlgmr.msra.gmra.mxu2 %vm51_vm0, %v2124_v12 }
 0x120   :  { %426 = vmatpush.msra.mxu1 %v133_v38  ;;  %486 = vmatpush.msrb.mxu0 %v145_v39  ;;  %v1815_v38 = vld [vmem:[%s2753_s4] ss:$0 sm:$0xff] }
 0x121   :  { %626 = vmatpush.msra.mxu3 %v173_v40  ;;  %686 = vmatpush.msrb.mxu2 %v185_v41 }
 0x122   :  { %503 = vmatpush.msrb.mxu1 %v152_v42  ;;  %563 = vmatpush.msra.mxu0 %v164_v43 }
 0x123   :  { %703 = vmatpush.msrb.mxu3 %v192_v44  ;;  %763 = vmatpush.msra.mxu2 %v204_v45 }
 0x124   :  { %504 = vmatpush.msrb.mxu1 %v151_v46  ;;  %564 = vmatpush.msra.mxu0 %v163_v47  ;;  %v1827_v47 = vld [vmem:[%s2753_s4 + $0xf] ss:$0 sm:$0xff] }
 0x125   :  { %704 = vmatpush.msrb.mxu3 %v191_v48  ;;  %764 = vmatpush.msra.mxu2 %v203_v49  ;;  %v1828_v48 = vld [vmem:[%s2753_s4 + $0x12] ss:$0 sm:$0xff]  ;;  %v1829_v49 = vld [vmem:[%s2753_s4 + $0x9] ss:$0 sm:$0xff] }
 0x126   :  { %1756 = vmatmul.msk.f32.vlgmr.msra.gmra.mxu1 %vm51_vm0, %v2155_v18  ;;  %1759 = vmatmul.msk.f32.vlgmr.msrb.gmra.mxu0 %vm51_vm0, %v2124_v12 }
 0x127   :  { %1766 = vmatmul.msk.f32.vlgmr.msra.gmra.mxu3 %vm51_vm0, %v2155_v18  ;;  %1769 = vmatmul.msk.f32.vlgmr.msrb.gmra.mxu2 %vm51_vm0, %v2124_v12 }
 0x128   :  { %505 = vmatpush.msrb.mxu1 %v150_v50  ;;  %565 = vmatpush.msra.mxu0 %v162_v51  ;;  %v1830_v50 = vld [vmem:[%s2753_s4 + $0xc] ss:$0 sm:$0xff]  ;;  %v1819_v51 = vld [vmem:[%s2753_s4 + $0x7] ss:$0 sm:$0xff] }
 0x129   :  { %705 = vmatpush.msrb.mxu3 %v190_v52  ;;  %765 = vmatpush.msra.mxu2 %v202_v53 }
 0x12a   :  { %506 = vmatpush.msrb.mxu1 %v149_v54  ;;  %566 = vmatpush.msra.mxu0 %v161_v55  ;;  %v1817_v54 = vld [vmem:[%s2753_s4 + $0x1] ss:$0 sm:$0xff]  ;;  %v1822_v55 = vld [vmem:[%s2753_s4 + $0x4] ss:$0 sm:$0xff] }
 0x12b   :  { %706 = vmatpush.msrb.mxu3 %v189_v56  ;;  %766 = vmatpush.msra.mxu2 %v201_v57 }
 0x12c   :  { %583 = vmatpush.msra.mxu1 %v168_v58  ;;  %643 = vmatpush.msrb.mxu0 %v180_v59 }
 0x12d   :  { %783 = vmatpush.msra.mxu3 %v208_v60 }
 0x12e   :  { %1760 = vmatmul.msk.f32.vlgmr.msrb.gmra.mxu1 %vm51_vm0, %v2155_v18  ;;  %1763 = vmatmul.msk.f32.vlgmr.msra.gmra.mxu0 %vm51_vm0, %v2124_v12 }
 0x12f   :  { %1770 = vmatmul.msk.f32.vlgmr.msrb.gmra.mxu3 %vm51_vm0, %v2155_v18  ;;  %1773 = vmatmul.msk.f32.vlgmr.msra.gmra.mxu2 %vm51_vm0, %v2124_v12 }
 0x130   :  { %584 = vmatpush.msra.mxu1 %v167_v61  ;;  %644 = vmatpush.msrb.mxu0 %v179_v62 }
 0x131   :  { %784 = vmatpush.msra.mxu3 %v207_v63 }
 0x132   :  { %585 = vmatpush.msra.mxu1 %v166_v0  ;;  %645 = vmatpush.msrb.mxu0 %v178_v1  ;;  %v1831_v1 = vld [vmem:[%s2753_s4 + $0x13] ss:$0 sm:$0xff] }
 0x133   :  { %785 = vmatpush.msra.mxu3 %v206_v2  ;;  %v1832_v2 = vld [vmem:[%s2753_s4 + $0x16] ss:$0 sm:$0xff] }
 0x134   :  { %586 = vmatpush.msra.mxu1 %v165_v3  ;;  %646 = vmatpush.msrb.mxu0 %v177_v4  ;;  %v1833_v3 = vld [vmem:[%s2753_s4 + $0xd] ss:$0 sm:$0xff]  ;;  %v1834_v4 = vld [vmem:[%s2753_s4 + $0x10] ss:$0 sm:$0xff] }
 0x135   :  { %786 = vmatpush.msra.mxu3 %v205_v5 }
 0x136   :  { %663 = vmatpush.msrb.mxu1 %v184_v6  ;;  %1767 = vmatmul.msk.f32.vlgmr.msrb.gmra.mxu0 %vm51_vm0, %v2124_v12 }
 0x137   :  { %1764 = vmatmul.msk.f32.vlgmr.msra.gmra.mxu1 %vm51_vm0, %v2155_v18  ;;  %1774 = vmatmul.msk.f32.vlgmr.msra.gmra.mxu3 %vm51_vm0, %v2155_v18 }
 0x138   :  { %723 = vmatpush.msra.mxu0 %v196_v7  ;;  %664 = vmatpush.msrb.mxu1 %v183_v8  ;;  %v1825_v7 = vld [vmem:[%s2753_s4 + $0x5] ss:$0 sm:$0xff] }
 0x13a   :  { %724 = vmatpush.msra.mxu0 %v195_v9  ;;  %665 = vmatpush.msrb.mxu1 %v182_v11 }
 0x13c   :  { %725 = vmatpush.msra.mxu0 %v194_v14  ;;  %666 = vmatpush.msrb.mxu1 %v181_v15 }
 0x13e   :  { %726 = vmatpush.msra.mxu0 %v193_v16  ;;  %743 = vmatpush.msra.mxu1 %v200_v13 }
 0x13f   :  { %1768 = vmatmul.msk.f32.vlgmr.msrb.gmra.mxu1 %vm51_vm0, %v2155_v18  ;;  %1771 = vmatmul.msk.f32.vlgmr.msra.gmra.mxu0 %vm51_vm0, %v2124_v12  ;;  %v1820_v12 = vld [vmem:[%s2753_s4 + $0xa] ss:$0 sm:$0xff] }
 0x140   :  { %744 = vmatpush.msra.mxu1 %v199_v17  ;;  %v1835_v17 = vld [vmem:[%s2753_s4 + $0x17] ss:$0 sm:$0xff] }
 0x142   :  { %745 = vmatpush.msra.mxu1 %v198_v19  ;;  %v1836_v19 = vld [vmem:[%s2753_s4 + $0x11] ss:$0 sm:$0xff] }
 0x144   :  { %746 = vmatpush.msra.mxu1 %v197_v20  ;;  %v1837_v20 = vld [vmem:[%s2753_s4 + $0x14] ss:$0 sm:$0xff] }
 0x147   :  { %1772 = vmatmul.msk.f32.vlgmr.msra.gmra.mxu1 %vm51_vm0, %v2155_v18 }
 0x18b   :  { %v325_v21 = vpop.f32.mrf.mxu0 }
 0x18c   :  { %v326_v46 = vadd.f32 %v1815_v38, %v325_v21 }
 0x191   :  { %v448_v22 = vpop.f32.mrf.mxu2 }
 0x192   :  { %v449_v44 = vadd.f32 %v1816_v34, %v448_v22 }
 0x193   :  { %v348_v23 = vpop.f32.mrf.mxu1  ;;  %v368_v24 = vpop.f32.mrf.mxu0 }
 0x194   :  { %v369_v18 = vadd.f32 %v1818_v25, %v368_v24  ;;  %v349_v63 = vadd.f32 %v1817_v54, %v348_v23 }
 0x19a   :  { %v468_v26 = vpop.f32.mrf.mxu3  ;;  %v528_v27 = vpop.f32.mrf.mxu2 }
 0x19b   :  { %v529_v28 = vadd.f32 %v1820_v12, %v528_v27  ;;  %v388_v29 = vpop.f32.mrf.mxu1  ;;  %v408_v30 = vpop.f32.mrf.mxu0  ;;  %v469_v62 = vadd.f32 %v1819_v51, %v468_v26  ;;  %v1838_v26 = vld [vmem:[%s2753_s4 + $0x15] ss:$0 sm:$0xff] }
 0x19c   :  { %v389_v45 = vadd.f32 %v1821_v35, %v388_v29  ;;  %v409_v0 = vadd.f32 %v1822_v55, %v408_v30  ;;  %v1008_v29 = vlaneseq }
 0x19d   :  { %1779 = vmatpush.xpose.msk.msrb.mxu2 %vm791_vm8, %v529_v28 }
 0x19e   :  { %v1009_v30 = vshrl.u32 %v1008_v29, 7 }
 0x1a0   :  { %1780 = vmatmul.msk.f32.vlgmr.msrb.gmra.mxu2 %vm791_vm8, %v369_v18  ;;  %v1011_v18 = vand.u32 127, %v1008_v29 }
 0x1a2   :  { %v548_v36 = vpop.f32.mrf.mxu3  ;;  %v608_v37 = vpop.f32.mrf.mxu2  ;;  %vm2457_vm9 = vcmp.ge.s32.totalorder %v1009_v30, %v1011_v18 }
 0x1a3   :  { %v549_v39 = vadd.f32 %v1823_v31, %v548_v36  ;;  %v609_v40 = vadd.f32 %v1824_v32, %v608_v37  ;;  %v428_v41 = vpop.f32.mrf.mxu1  ;;  %v488_v42 = vpop.f32.mrf.mxu0 }
 0x1a4   :  { %v489_v43 = vadd.f32 %v1826_v33, %v488_v42  ;;  %v429_v13 = vadd.f32 %v1825_v7, %v428_v41 }
 0x1a5   :  { %1781 = vmatpush.xpose.msk.msrb.mxu3 %vm791_vm8, %v549_v39  ;;  %1787 = vmatpush.xpose.msk.msra.mxu2 %vm791_vm8, %v609_v40 }
 0x1a6   :  { %1775 = vmatpush.xpose.msk.msrb.mxu0 %vm791_vm8, %v489_v43 }
 0x1a8   :  { %1782 = vmatmul.msk.f32.vlgmr.msrb.gmra.mxu3 %vm791_vm8, %v389_v45  ;;  %1788 = vmatmul.msk.f32.vlgmr.msra.gmra.mxu2 %vm791_vm8, %v449_v44 }
 0x1a9   :  { %1776 = vmatmul.msk.f32.vlgmr.msrb.gmra.mxu0 %vm791_vm8, %v326_v46 }
 0x1aa   :  { %v628_v52 = vpop.f32.mrf.mxu3  ;;  %v688_v53 = vpop.f32.mrf.mxu2 }
 0x1ab   :  { %v629_v56 = vadd.f32 %v1827_v47, %v628_v52  ;;  %v689_v57 = vadd.f32 %v1828_v48, %v688_v53  ;;  %v508_v58 = vpop.f32.mrf.mxu1  ;;  %v568_v59 = vpop.f32.mrf.mxu0 }
 0x1ac   :  { %v509_v60 = vadd.f32 %v1829_v49, %v508_v58  ;;  %v569_v61 = vadd.f32 %v1830_v50, %v568_v59 }
 0x1ad   :  { %1789 = vmatpush.xpose.msk.msra.mxu3 %vm791_vm8, %v629_v56  ;;  %1183 = vmatpush.msrb.mxu2 %v689_v57 }
 0x1ae   :  { %1777 = vmatpush.xpose.msk.msrb.mxu1 %vm791_vm8, %v509_v60  ;;  %1783 = vmatpush.xpose.msk.msra.mxu0 %vm791_vm8, %v569_v61 }
 0x1b0   :  { %1790 = vmatmul.msk.f32.vlgmr.msra.gmra.mxu3 %vm791_vm8, %v469_v62 }
 0x1b1   :  { %1778 = vmatmul.msk.f32.vlgmr.msrb.gmra.mxu1 %vm791_vm8, %v349_v63  ;;  %1784 = vmatmul.msk.f32.vlgmr.msra.gmra.mxu0 %vm791_vm8, %v409_v0 }
 0x1b2   :  { %v708_v5 = vpop.f32.mrf.mxu3  ;;  %v768_v6 = vpop.f32.mrf.mxu2 }
 0x1b3   :  { %v709_v8 = vadd.f32 %v1831_v1, %v708_v5  ;;  %v769_v9 = vadd.f32 %v1832_v2, %v768_v6  ;;  %v648_v14 = vpop.f32.mrf.mxu0 }
 0x1b4   :  { %v588_v11 = vpop.f32.mrf.mxu1  ;;  %v649_v16 = vadd.f32 %v1834_v4, %v648_v14 }
 0x1b5   :  { %v589_v15 = vadd.f32 %v1833_v3, %v588_v11  ;;  %1206 = vmatpush.msrb.mxu3 %v709_v8  ;;  %1275 = vmatpush.msra.mxu2 %v769_v9 }
 0x1b6   :  { %1137 = vmatpush.msrb.mxu0 %v649_v16 }
 0x1b7   :  { %1785 = vmatpush.xpose.msk.msra.mxu1 %vm791_vm8, %v589_v15 }
 0x1ba   :  { %1786 = vmatmul.msk.f32.vlgmr.msra.gmra.mxu1 %vm791_vm8, %v429_v13  ;;  %v788_v21 = vpop.f32.mrf.mxu3 }
 0x1bb   :  { %v789_v22 = vadd.f32 %v1835_v17, %v788_v21 }
 0x1bc   :  { %v668_v23 = vpop.f32.mrf.mxu1  ;;  %v728_v24 = vpop.f32.mrf.mxu0 }
 0x1bd   :  { %v669_v12 = vadd.f32 %v1836_v19, %v668_v23  ;;  %v729_v25 = vadd.f32 %v1837_v20, %v728_v24  ;;  %1298 = vmatpush.msra.mxu3 %v789_v22 }
 0x1bf   :  { %1160 = vmatpush.msrb.mxu1 %v669_v12  ;;  %1229 = vmatpush.msra.mxu0 %v729_v25 }
 0x1c4   :  { %v748_v27 = vpop.f32.mrf.mxu1 }
 0x1c5   :  { %v749_v28 = vadd.f32 %v1838_v26, %v748_v27 }
 0x1c7   :  { %1252 = vmatpush.msra.mxu1 %v749_v28 }
 0x223   :  { %v867_v31 = vpop.f32.mrf.mxu2 }
 0x224   :  { %v1002_v33 = vmul.f32 0.35355338, %v867_v31 }
 0x226   :  { %v1017_v34 = vsel %vm2457_vm9, %v1002_v33, -3.4028235e+38  ;;  %v815_v36 = vpop.f32.mrf.mxu0 }
 0x227   :  { %v1029_v35 = vsel %vm791_vm8, %v1017_v34, -inf  ;;  %v1000_v46 = vmul.f32 0.35355338, %v815_v36 }
 0x228   :  { %1030 = vmax.xlane.f32.xlu2 %v1029_v35 }
 0x229   :  { %v1015_v50 = vsel %vm2457_vm9, %v1000_v46, -3.4028235e+38 }
 0x22a   :  { %v1023_v55 = vsel %vm791_vm8, %v1015_v50, -inf }
 0x22b   :  { %v893_v37 = vpop.f32.mrf.mxu3  ;;  %v971_v38 = vpop.f32.mrf.mxu2 }
 0x22c   :  { %v1003_v39 = vmul.f32 0.35355338, %v893_v37  ;;  %v1006_v40 = vmul.f32 0.35355338, %v971_v38 }
 0x22e   :  { %v841_v41 = vpop.f32.mrf.mxu1  ;;  %v1021_v42 = vsel %vm2457_vm9, %v1006_v40, -3.4028235e+38  ;;  %v1018_v43 = vsel %vm2457_vm9, %v1003_v39, -3.4028235e+38  ;;  %v919_v51 = vpop.f32.mrf.mxu0 }
 0x22f   :  { %v1041_v44 = vsel %vm791_vm8, %v1021_v42, -inf  ;;  %v1032_v45 = vsel %vm791_vm8, %v1018_v43, -inf  ;;  %v1001_v47 = vmul.f32 0.35355338, %v841_v41  ;;  %v1004_v57 = vmul.f32 0.35355338, %v919_v51 }
 0x230   :  { %1042 = vmax.xlane.f32.xlu0 %v1041_v44  ;;  %1033 = vmax.xlane.f32.xlu2 %v1032_v45 }
 0x231   :  { %v1016_v52 = vsel %vm2457_vm9, %v1001_v47, -3.4028235e+38  ;;  %v1019_v60 = vsel %vm2457_vm9, %v1004_v57, -3.4028235e+38 }
 0x232   :  { %v1026_v59 = vsel %vm791_vm8, %v1016_v52, -inf  ;;  %v1035_v62 = vsel %vm791_vm8, %v1019_v60, -inf }
 0x233   :  { %v997_v48 = vpop.f32.mrf.mxu3 }
 0x234   :  { %v1007_v49 = vmul.f32 0.35355338, %v997_v48 }
 0x236   :  { %v1022_v54 = vsel %vm2457_vm9, %v1007_v49, -3.4028235e+38 }
 0x237   :  { %v945_v53 = vpop.f32.mrf.mxu1  ;;  %v1044_v56 = vsel %vm791_vm8, %v1022_v54, -inf }
 0x238   :  { %v1005_v58 = vmul.f32 0.35355338, %v945_v53  ;;  %1024 = vmax.xlane.f32.xlu2 %v1023_v55  ;;  %1045 = vmax.xlane.f32.xlu1 %v1044_v56 }
 0x239   :  { %1027 = vmax.xlane.f32.xlu0 %v1026_v59 }
 0x23a   :  { %v1020_v61 = vsel %vm2457_vm9, %v1005_v58, -3.4028235e+38 }
 0x23b   :  { %v1038_v63 = vsel %vm791_vm8, %v1020_v61, -inf }
 0x240   :  { %1036 = vmax.xlane.f32.xlu1 %v1035_v62  ;;  %1039 = vmax.xlane.f32.xlu2 %v1038_v63 }
 0x29b   :  { %v1031_v0 = vpop.xlane.xlu2 %1030 }
 0x29c   :  { %v1049_v1 = vsub.f32 %v1017_v34, %v1031_v0 }
 0x29e   :  { %v1059_v2 = vmul.f32 1.442695, %v1049_v1  ;;  %v1305_v1 = vld [vmem:[%s2754_s5 + $0x10] sm:$0xff] }
 0x2a0   :  { %1850 = vpow2.f32 %v1059_v2  ;;  %v1306_v2 = vld [vmem:[%s2754_s5 + $0x18] sm:$0xff] }
 0x2a3   :  { %v1034_v3 = vpop.xlane.xlu2 %1033  ;;  %v1043_v4 = vpop.xlane.xlu0 %1042 }
 0x2a4   :  { %v1050_v5 = vsub.f32 %v1018_v43, %v1034_v3  ;;  %v1053_v6 = vsub.f32 %v1021_v42, %v1043_v4  ;;  %v1309_v3 = vld [vmem:[%s2754_s5 + $0x30] sm:$0xff]  ;;  %v1303_v4 = vld [vmem:[%s2754_s5] sm:$0xff] }
 0x2a6   :  { %v1851_v7 = vpop.eup %1850  ;;  %v1061_v8 = vmul.f32 1.442695, %v1050_v5  ;;  %v1067_v9 = vmul.f32 1.442695, %v1053_v6  ;;  %v1304_v5 = vld [vmem:[%s2754_s5 + $0x8] sm:$0xff]  ;;  %v1310_v6 = vld [vmem:[%s2754_s5 + $0x38] sm:$0xff] }
 0x2a7   :  { %v1077_v11 = vsel %vm791_vm8, %v1851_v7, 0.0 }
 0x2a8   :  { %1852 = vpow2.f32 %v1061_v8  ;;  %1078 = vadd.xlane.f32.xlu0 %v1077_v11  ;;  %v1308_v8 = vld [vmem:[%s2754_s5 + $0x28] sm:$0xff] }
 0x2a9   :  { %1854 = vpow2.f32 %v1067_v9 }
 0x2ab   :  { %v1025_v14 = vpop.xlane.xlu2 %1024  ;;  %v1046_v15 = vpop.xlane.xlu1 %1045 }
 0x2ac   :  { %v1047_v16 = vsub.f32 %v1015_v50, %v1025_v14  ;;  %v1054_v13 = vsub.f32 %v1022_v54, %v1046_v15  ;;  %v1028_v17 = vpop.xlane.xlu0 %1027 }
 0x2ad   :  { %v1048_v19 = vsub.f32 %v1016_v52, %v1028_v17 }
 0x2ae   :  { %v1853_v20 = vpop.eup %1852  ;;  %v1055_v21 = vmul.f32 1.442695, %v1047_v16  ;;  %v1069_v22 = vmul.f32 1.442695, %v1054_v13 }
 0x2af   :  { %v1855_v23 = vpop.eup %1854  ;;  %v1057_v24 = vmul.f32 1.442695, %v1048_v19  ;;  %v1080_v12 = vsel %vm791_vm8, %v1853_v20, 0.0 }
 0x2b0   :  { %1856 = vpow2.f32 %v1055_v21  ;;  %1081 = vadd.xlane.f32.xlu1 %v1080_v12  ;;  %v1089_v25 = vsel %vm791_vm8, %v1855_v23, 0.0 }
 0x2b1   :  { %1858 = vpow2.f32 %v1069_v22  ;;  %1090 = vadd.xlane.f32.xlu2 %v1089_v25 }
 0x2b2   :  { %1860 = vpow2.f32 %v1057_v24 }
 0x2b3   :  { %v1037_v26 = vpop.xlane.xlu1 %1036  ;;  %v1040_v27 = vpop.xlane.xlu2 %1039 }
 0x2b4   :  { %v1051_v28 = vsub.f32 %v1019_v60, %v1037_v26  ;;  %v1052_v29 = vsub.f32 %v1020_v61, %v1040_v27 }
 0x2b6   :  { %v1857_v30 = vpop.eup %1856  ;;  %v1063_v18 = vmul.f32 1.442695, %v1051_v28  ;;  %v1065_v31 = vmul.f32 1.442695, %v1052_v29 }
 0x2b7   :  { %v1859_v32 = vpop.eup %1858  ;;  %v1071_v33 = vsel %vm791_vm8, %v1857_v30, 0.0 }
 0x2b8   :  { %v1861_v34 = vpop.eup %1860  ;;  %1862 = vpow2.f32 %v1063_v18  ;;  %1072 = vadd.xlane.f32.xlu1 %v1071_v33  ;;  %v1092_v35 = vsel %vm791_vm8, %v1859_v32, 0.0 }
 0x2b9   :  { %1864 = vpow2.f32 %v1065_v31  ;;  %1093 = vadd.xlane.f32.xlu0 %v1092_v35  ;;  %v1074_v36 = vsel %vm791_vm8, %v1861_v34, 0.0 }
 0x2ba   :  { %1075 = vadd.xlane.f32.xlu2 %v1074_v36 }
 0x2be   :  { %v1863_v37 = vpop.eup %1862 }
 0x2bf   :  { %v1865_v38 = vpop.eup %1864  ;;  %v1083_v39 = vsel %vm791_vm8, %v1863_v37, 0.0 }
 0x2c0   :  { %v1086_v40 = vsel %vm791_vm8, %v1865_v38, 0.0 }
 0x2c1   :  { %1084 = vadd.xlane.f32.xlu0 %v1083_v39  ;;  %1087 = vadd.xlane.f32.xlu1 %v1086_v40 }
 0x31b   :  { %v1079_v41 = vpop.xlane.xlu0 %1078 }
 0x31c   :  { %1866 = vrcp.f32 %v1079_v41 }
 0x322   :  { %v1867_v42 = vpop.eup %1866 }
 0x323   :  { %v1105_v43 = vmul.f32 %v1867_v42, %v1851_v7  ;;  %v1082_v44 = vpop.xlane.xlu1 %1081  ;;  %v1307_v7 = vld [vmem:[%s2754_s5 + $0x20] sm:$0xff] }
 0x324   :  { %1868 = vrcp.f32 %v1082_v44  ;;  %v1091_v45 = vpop.xlane.xlu2 %1090 }
 0x325   :  { %1113 = vst.msk [vmem:[%s2763_s14 + $0x10] sm:$0xff] %vm791_vm8, %v1105_v43  ;;  %1870 = vrcp.f32 %v1091_v45  ;;  %1793 = vmatmul.msk.f32.vlgmr.msrb.gmra.mxu2 %vm791_vm8, %v1105_v43  ;;  %v1890_v43 = vld [vmem:[%s2749_s0] sm:$0xff]  ;;  %v1891_v45 = vld [vmem:[%s2749_s0 + $0x8] sm:$0xff] }
 0x326   :  { %1375 = vmatpush.msrb.mxu2 %v1305_v1  ;;  %v1578_v1 = vld [vmem:[%s2758_s9 + $0x28] sm:$0xff] }
 0x32a   :  { %v1869_v46 = vpop.eup %1868 }
 0x32b   :  { %v1871_v47 = vpop.eup %1870  ;;  %v1106_v48 = vmul.f32 %v1869_v46, %v1853_v20  ;;  %v1073_v49 = vpop.xlane.xlu1 %1072 }
 0x32c   :  { %v1109_v50 = vmul.f32 %v1871_v47, %v1855_v23  ;;  %1872 = vrcp.f32 %v1073_v49  ;;  %v1094_v51 = vpop.xlane.xlu0 %1093 }
 0x32d   :  { %1114 = vst.msk [vmem:[%s2763_s14 + $0x18] sm:$0xff] %vm791_vm8, %v1106_v48  ;;  %v1076_v52 = vpop.xlane.xlu2 %1075  ;;  %1874 = vrcp.f32 %v1094_v51  ;;  %1794 = vmatmul.msk.f32.vlgmr.msrb.gmra.mxu3 %vm791_vm8, %v1106_v48 }
 0x32e   :  { %1117 = vst.msk [vmem:[%s2763_s14 + $0x30] sm:$0xff] %vm791_vm8, %v1109_v50  ;;  %1876 = vrcp.f32 %v1076_v52  ;;  %1797 = vmatmul.msk.f32.vlgmr.msra.gmra.mxu2 %vm791_vm8, %v1109_v50  ;;  %1398 = vmatpush.msrb.mxu3 %v1306_v2  ;;  %v1577_v2 = vld [vmem:[%s2758_s9 + $0x20] sm:$0xff] }
 0x32f   :  { %1467 = vmatpush.msra.mxu2 %v1309_v3  ;;  %v1664_v3 = vld [vmem:[%s2760_s11 + $0x78] sm:$0xff] }
 0x332   :  { %v1873_v53 = vpop.eup %1872 }
 0x333   :  { %v1875_v54 = vpop.eup %1874  ;;  %v1103_v55 = vmul.f32 %v1873_v53, %v1857_v30 }
 0x334   :  { %v1877_v56 = vpop.eup %1876  ;;  %v1110_v57 = vmul.f32 %v1875_v54, %v1859_v32  ;;  %v1088_v58 = vpop.xlane.xlu1 %1087 }
 0x335   :  { %v1085_v59 = vpop.xlane.xlu0 %1084  ;;  %1111 = vst.msk [vmem:[%s2763_s14] sm:$0xff] %vm791_vm8, %v1103_v55  ;;  %v1104_v60 = vmul.f32 %v1877_v56, %v1861_v34  ;;  %1878 = vrcp.f32 %v1088_v58  ;;  %1791 = vmatmul.msk.f32.vlgmr.msrb.gmra.mxu0 %vm791_vm8, %v1103_v55  ;;  %v1839_v34 = vld [vmem:[%s2755_s6] ss:$0 sm:$0xff] }
 0x336   :  { %1118 = vst.msk [vmem:[%s2763_s14 + $0x38] sm:$0xff] %vm791_vm8, %v1110_v57  ;;  %1880 = vrcp.f32 %v1085_v59  ;;  %1798 = vmatmul.msk.f32.vlgmr.msra.gmra.mxu3 %vm791_vm8, %v1110_v57  ;;  %1329 = vmatpush.msrb.mxu0 %v1303_v4  ;;  %v1576_v59 = vld [vmem:[%s2758_s9 + $0x18] sm:$0xff]  ;;  %v1663_v4 = vld [vmem:[%s2760_s11 + $0x70] sm:$0xff] }
 0x337   :  { %1112 = vst.msk [vmem:[%s2763_s14 + $0x8] sm:$0xff] %vm791_vm8, %v1104_v60  ;;  %1792 = vmatmul.msk.f32.vlgmr.msrb.gmra.mxu1 %vm791_vm8, %v1104_v60  ;;  %1490 = vmatpush.msra.mxu3 %v1310_v6  ;;  %v1575_v60 = vld [vmem:[%s2758_s9 + $0x10] sm:$0xff] }
 0x338   :  { %1352 = vmatpush.msrb.mxu1 %v1304_v5  ;;  %v1680_v5 = vld [vmem:[%s2760_s11 + $0xf8] sm:$0xff]  ;;  %v1679_v6 = vld [vmem:[%s2760_s11 + $0xf0] sm:$0xff] }
 0x33b   :  { %v1879_v61 = vpop.eup %1878 }
 0x33c   :  { %v1881_v62 = vpop.eup %1880  ;;  %v1108_v63 = vmul.f32 %v1879_v61, %v1865_v38  ;;  %v1580_v61 = vld [vmem:[%s2758_s9 + $0x38] sm:$0xff] }
 0x33d   :  { %v1107_v0 = vmul.f32 %v1881_v62, %v1863_v37  ;;  %v1574_v62 = vld [vmem:[%s2758_s9 + $0x8] sm:$0xff] }
 0x33e   :  { %1116 = vst.msk [vmem:[%s2763_s14 + $0x28] sm:$0xff] %vm791_vm8, %v1108_v63 }
 0x33f   :  { %1115 = vst.msk [vmem:[%s2763_s14 + $0x20] sm:$0xff] %vm791_vm8, %v1107_v0  ;;  %1795 = vmatmul.msk.f32.vlgmr.msra.gmra.mxu0 %vm791_vm8, %v1107_v0  ;;  %1796 = vmatmul.msk.f32.vlgmr.msra.gmra.mxu1 %vm791_vm8, %v1108_v63  ;;  %v1579_v63 = vld [vmem:[%s2758_s9 + $0x30] sm:$0xff]  ;;  %v1573_v0 = vld [vmem:[%s2758_s9] sm:$0xff]  ;;  %s1733_s14 = sshll.u32 %s1919_s30, 4  ;;  %s1734_s14 = int_to_ptr.vmem [resolvable:$true] %s1733_s14 }
 0x340   :  { %1421 = vmatpush.msra.mxu0 %v1307_v7  ;;  %1444 = vmatpush.msra.mxu1 %v1308_v8  ;;  %v1662_v8 = vld [vmem:[%s2760_s11 + $0x68] sm:$0xff] }
 0x3a8   :  { %v1185_v9 = vpop.f32.mrf.mxu2 }
 0x3a9   :  { %1801 = vmatmul.msk.f32.vlgmr.msrb.gmra.mxu2 %vm791_vm8, %v1185_v9  ;;  %v1678_v9 = vld [vmem:[%s2760_s11 + $0xe8] sm:$0xff] }
 0x3aa   :  { %1685 = vmatpush.msrb.mxu2 %v1664_v3 }
 0x3ac   :  { %1686 = vmatpush.msrb.mxu2 %v1663_v4 }
 0x3ae   :  { %1687 = vmatpush.msrb.mxu2 %v1662_v8 }
 0x3b0   :  { %v1208_v11 = vpop.f32.mrf.mxu3 }
 0x3b1   :  { %v1277_v14 = vpop.f32.mrf.mxu2  ;;  %1802 = vmatmul.msk.f32.vlgmr.msrb.gmra.mxu3 %vm791_vm8, %v1208_v11 }
 0x3b2   :  { %1805 = vmatmul.msk.f32.vlgmr.msra.gmra.mxu2 %vm791_vm8, %v1277_v14  ;;  %v1139_v15 = vpop.f32.mrf.mxu0  ;;  %1705 = vmatpush.msrb.mxu3 %v1680_v5 }
 0x3b3   :  { %1799 = vmatmul.msk.f32.vlgmr.msrb.gmra.mxu0 %vm791_vm8, %v1139_v15 }
 0x3b4   :  { %v1162_v16 = vpop.f32.mrf.mxu1  ;;  %1600 = vmatpush.msrb.mxu0 %v1576_v59  ;;  %1706 = vmatpush.msrb.mxu3 %v1679_v6  ;;  %v1668_v59 = vld [vmem:[%s2760_s11 + $0x98] sm:$0xff] }
 0x3b5   :  { %1800 = vmatmul.msk.f32.vlgmr.msrb.gmra.mxu1 %vm791_vm8, %v1162_v16  ;;  %v1661_v16 = vld [vmem:[%s2760_s11 + $0x60] sm:$0xff] }
 0x3b6   :  { %1601 = vmatpush.msrb.mxu0 %v1575_v60  ;;  %1623 = vmatpush.msrb.mxu1 %v1580_v61  ;;  %v1650_v60 = vld [vmem:[%s2760_s11 + $0x8] sm:$0xff]  ;;  %v1667_v61 = vld [vmem:[%s2760_s11 + $0x90] sm:$0xff] }
 0x3b7   :  { %1707 = vmatpush.msrb.mxu3 %v1678_v9  ;;  %1688 = vmatpush.msrb.mxu2 %v1661_v16 }
 0x3b8   :  { %1602 = vmatpush.msrb.mxu0 %v1574_v62  ;;  %1624 = vmatpush.msrb.mxu1 %v1579_v63  ;;  %v1649_v62 = vld [vmem:[%s2760_s11] sm:$0xff]  ;;  %v1666_v63 = vld [vmem:[%s2760_s11 + $0x88] sm:$0xff] }
 0x3b9   :  { %v1300_v13 = vpop.f32.mrf.mxu3 }
 0x3ba   :  { %1806 = vmatmul.msk.f32.vlgmr.msra.gmra.mxu3 %vm791_vm8, %v1300_v13  ;;  %1603 = vmatpush.msrb.mxu0 %v1573_v0  ;;  %v1665_v0 = vld [vmem:[%s2760_s11 + $0x80] sm:$0xff] }
 0x3bb   :  { %1625 = vmatpush.msrb.mxu1 %v1578_v1  ;;  %v1842_v1 = vld [vmem:[%s2759_s10] ss:$0 sm:$0xff] }
 0x3bc   :  { %v1231_v17 = vpop.f32.mrf.mxu0  ;;  %v1254_v19 = vpop.f32.mrf.mxu1 }
 0x3bd   :  { %1803 = vmatmul.msk.f32.vlgmr.msra.gmra.mxu0 %vm791_vm8, %v1231_v17  ;;  %1804 = vmatmul.msk.f32.vlgmr.msra.gmra.mxu1 %vm791_vm8, %v1254_v19 }
 0x3be   :  { %1626 = vmatpush.msrb.mxu1 %v1577_v2 }
 0x42c   :  { %v1377_v20 = vpop.f32.mrf.mxu2 }
 0x42d   :  { %v1496_v25 = vsel %vm51_vm0, %v1377_v20, 0.0 }
 0x430   :  { %v1331_v21 = vpop.f32.mrf.mxu0 }
 0x431   :  { %v1495_v24 = vsel %vm51_vm0, %v1331_v21, 0.0 }
 0x432   :  { %v1354_v22 = vpop.f32.mrf.mxu1  ;;  %v1497_v27 = vadd.f32 %v1496_v25, %v1495_v24 }
 0x433   :  { %v1502_v28 = vsel %vm51_vm0, %v1354_v22, 0.0 }
 0x434   :  { %v1400_v23 = vpop.f32.mrf.mxu3 }
 0x435   :  { %v1503_v12 = vsel %vm51_vm0, %v1400_v23, 0.0  ;;  %v1469_v26 = vpop.f32.mrf.mxu2 }
 0x436   :  { %v1504_v18 = vadd.f32 %v1503_v12, %v1502_v28  ;;  %v1500_v35 = vsel %vm51_vm0, %v1469_v26, 0.0  ;;  %v1840_v28 = vld [vmem:[%s2756_s7] ss:$0 sm:$0xff] }
 0x43a   :  { %v1423_v29 = vpop.f32.mrf.mxu0  ;;  %v1446_v30 = vpop.f32.mrf.mxu1 }
 0x43b   :  { %v1498_v31 = vsel %vm51_vm0, %v1423_v29, 0.0  ;;  %v1505_v32 = vsel %vm51_vm0, %v1446_v30, 0.0 }
 0x43c   :  { %v1499_v33 = vadd.f32 %v1498_v31, %v1497_v27  ;;  %v1506_v36 = vadd.f32 %v1505_v32, %v1504_v18  ;;  %v1841_v32 = vld [vmem:[%s2757_s8] ss:$0 sm:$0xff] }
 0x43d   :  { %v1492_v37 = vpop.f32.mrf.mxu3 }
 0x43e   :  { %v1501_v38 = vadd.f32 %v1500_v35, %v1499_v33  ;;  %v1507_v39 = vsel %vm51_vm0, %v1492_v37, 0.0 }
 0x43f   :  { %v1508_v40 = vadd.f32 %v1507_v39, %v1506_v36  ;;  %v1677_v39 = vld [vmem:[%s2760_s11 + $0xe0] sm:$0xff] }
 0x440   :  { %v1513_v41 = vadd.f32 %v1839_v34, %v1501_v38  ;;  %v1660_v38 = vld [vmem:[%s2760_s11 + $0x58] sm:$0xff]  ;;  %1708 = vmatpush.msrb.mxu3 %v1677_v39 }
 0x441   :  { %v1514_v42 = vadd.f32 %v1839_v34, %v1508_v40  ;;  %1689 = vmatpush.msrb.mxu2 %v1660_v38  ;;  %v1659_v40 = vld [vmem:[%s2760_s11 + $0x50] sm:$0xff] }
 0x442   :  { %v2579_v44 = vadd.f32 %v1890_v43, %v1513_v41  ;;  %v1676_v41 = vld [vmem:[%s2760_s11 + $0xd8] sm:$0xff]  ;;  %v1675_v43 = vld [vmem:[%s2760_s11 + $0xd0] sm:$0xff] }
 0x443   :  { %v2584_v46 = vadd.f32 %v1891_v45, %v1514_v42  ;;  %1690 = vmatpush.msrb.mxu2 %v1659_v40  ;;  %1709 = vmatpush.msrb.mxu3 %v1676_v41  ;;  %v1658_v42 = vld [vmem:[%s2760_s11 + $0x48] sm:$0xff]  ;;  %v1657_v45 = vld [vmem:[%s2760_s11 + $0x40] sm:$0xff] }
 0x444   :  { %v1519_v47 = vsel %vm51_vm0, %v2579_v44, 0.0 }
 0x445   :  { %1520 = vadd.xlane.f32.xlu2 %v1519_v47  ;;  %v1522_v48 = vsel %vm51_vm0, %v2584_v46, 0.0  ;;  %1691 = vmatpush.msrb.mxu2 %v1658_v42  ;;  %v1674_v47 = vld [vmem:[%s2760_s11 + $0xc8] sm:$0xff] }
 0x446   :  { %1523 = vadd.xlane.f32.xlu0 %v1522_v48  ;;  %1710 = vmatpush.msrb.mxu3 %v1675_v43  ;;  %v1656_v48 = vld [vmem:[%s2760_s11 + $0x38] sm:$0xff] }
 0x447   :  { %1692 = vmatpush.msrb.mxu2 %v1657_v45 }
 0x448   :  { %1711 = vmatpush.msrb.mxu3 %v1674_v47 }
 0x449   :  { %1693 = vmatpush.msrb.mxu2 %v1656_v48 }
 0x4b8   :  { %v1521_v49 = vpop.xlane.xlu2 %1520 }
 0x4b9   :  { %v1525_v50 = vmul.f32 %v1521_v49, %v2005_v10  ;;  %v1524_v51 = vpop.xlane.xlu0 %1523  ;;  %v1673_v49 = vld [vmem:[%s2760_s11 + $0xc0] sm:$0xff] }
 0x4ba   :  { %v1526_v52 = vmul.f32 %v1524_v51, %v2005_v10  ;;  %1712 = vmatpush.msrb.mxu3 %v1673_v49  ;;  %v1672_v51 = vld [vmem:[%s2760_s11 + $0xb8] sm:$0xff] }
 0x4bb   :  { %v2593_v53 = vsub.f32 %v2579_v44, %v1525_v50  ;;  %v1655_v50 = vld [vmem:[%s2760_s11 + $0x30] sm:$0xff] }
 0x4bc   :  { %v2596_v54 = vsub.f32 %v2584_v46, %v1526_v52  ;;  %v1654_v52 = vld [vmem:[%s2760_s11 + $0x28] sm:$0xff]  ;;  %1694 = vmatpush.msrb.mxu2 %v1655_v50  ;;  %1713 = vmatpush.msrb.mxu3 %v1672_v51 }
 0x4bd   :  { %v1529_v55 = vmul.f32 %v2593_v53, %v2593_v53 }
 0x4be   :  { %v1530_v56 = vmul.f32 %v2596_v54, %v2596_v54  ;;  %1695 = vmatpush.msrb.mxu2 %v1654_v52 }
 0x4bf   :  { %v1531_v57 = vsel %vm51_vm0, %v1529_v55, 0.0  ;;  %v1670_v55 = vld [vmem:[%s2760_s11 + $0xa8] sm:$0xff] }
 0x4c0   :  { %1532 = vadd.xlane.f32.xlu1 %v1531_v57  ;;  %v1534_v58 = vsel %vm51_vm0, %v1530_v56, 0.0  ;;  %v1652_v56 = vld [vmem:[%s2760_s11 + $0x18] sm:$0xff]  ;;  %v1669_v57 = vld [vmem:[%s2760_s11 + $0xa0] sm:$0xff] }
 0x4c1   :  { %1535 = vadd.xlane.f32.xlu2 %v1534_v58  ;;  %v1651_v58 = vld [vmem:[%s2760_s11 + $0x10] sm:$0xff] }
 0x533   :  { %v1533_v7 = vpop.xlane.xlu1 %1532 }
 0x534   :  { %v1537_v11 = vmul.f32 %v1533_v7, %v2005_v10  ;;  %v1536_v14 = vpop.xlane.xlu2 %1535 }
 0x535   :  { %v1538_v15 = vmul.f32 %v1536_v14, %v2005_v10 }
 0x536   :  { %v1539_v13 = vadd.f32 1e-05, %v1537_v11 }
 0x537   :  { %v1540_v17 = vadd.f32 1e-05, %v1538_v15 }
 0x538   :  { %1882 = vrsqrt.f32 %v1539_v13  ;;  %vm1547_vm12 = vweird.f32 %v1539_v13 }
 0x539   :  { %1884 = vrsqrt.f32 %v1540_v17  ;;  %vm1557_vm14 = vweird.f32 %v1540_v17 }
 0x53e   :  { %v1883_v19 = vpop.eup %1882 }
 0x53f   :  { %v1885_v20 = vpop.eup %1884  ;;  %v1542_v21 = vmul.f32 %v1883_v19, %v1539_v13  ;;  %vm1548_vm10 = vweird.f32 %v1883_v19 }
 0x540   :  { %v1552_v22 = vmul.f32 %v1885_v20, %v1540_v17  ;;  %vm1558_vm11 = vweird.f32 %v1885_v20  ;;  %vm1549_vm13 = vmor %vm1547_vm12, %vm1548_vm10 }
 0x541   :  { %v1543_v23 = vmul.f32 %v1883_v19, %v1542_v21  ;;  %vm1559_vm15 = vmor %vm1557_vm14, %vm1558_vm11 }
 0x542   :  { %v1553_v24 = vmul.f32 %v1885_v20, %v1552_v22 }
 0x543   :  { %v1544_v12 = vmul.f32 0.5, %v1543_v23 }
 0x544   :  { %v1554_v25 = vmul.f32 0.5, %v1553_v24 }
 0x545   :  { %v1545_v10 = vsub.f32 1.5, %v1544_v12 }
 0x546   :  { %v1555_v26 = vsub.f32 1.5, %v1554_v25 }
 0x547   :  { %v1546_v27 = vmul.f32 %v1883_v19, %v1545_v10  ;;  %v1843_v10 = vld [vmem:[%s2761_s12] ss:$0 sm:$0xff]  ;;  %s1920_s12 = smov 128  }
 0x548   :  { %v1556_v29 = vmul.f32 %v1885_v20, %v1555_v26 }
 0x549   :  { %v1550_v30 = vsel %vm1549_vm13, %v1883_v19, %v1546_v27 }
 0x54a   :  { %v1561_v18 = vmul.f32 %v1550_v30, %v2593_v53  ;;  %v1560_v31 = vsel %vm1559_vm15, %v1885_v20, %v1556_v29  ;;  %v1671_v53 = vld [vmem:[%s2760_s11 + $0xb0] sm:$0xff] }
 0x54b   :  { %v1562_v33 = vmul.f32 %v1560_v31, %v2596_v54  ;;  %v1653_v54 = vld [vmem:[%s2760_s11 + $0x20] sm:$0xff]  ;;  %1714 = vmatpush.msrb.mxu3 %v1671_v53 }
 0x54c   :  { %v1566_v34 = vmul.f32 %v1840_v28, %v1561_v18  ;;  %1696 = vmatpush.msrb.mxu2 %v1653_v54 }
 0x54d   :  { %v1567_v35 = vmul.f32 %v1840_v28, %v1562_v33  ;;  %1715 = vmatpush.msrb.mxu3 %v1670_v55 }
 0x54e   :  { %v1571_v36 = vadd.f32 %v1841_v32, %v1566_v34  ;;  %1697 = vmatpush.msrb.mxu2 %v1652_v56 }
 0x54f   :  { %v1572_v37 = vadd.f32 %v1841_v32, %v1567_v35  ;;  %1716 = vmatpush.msrb.mxu3 %v1669_v57 }
 0x550   :  { %1807 = vmatmul.msk.f32.vlgmr.msrb.gmra.mxu0 %vm51_vm0, %v1571_v36  ;;  %1698 = vmatpush.msrb.mxu2 %v1651_v58 }
 0x551   :  { %1808 = vmatmul.msk.f32.vlgmr.msrb.gmra.mxu1 %vm51_vm0, %v1572_v37  ;;  %1717 = vmatpush.msrb.mxu3 %v1668_v59 }
 0x552   :  { %1699 = vmatpush.msrb.mxu2 %v1650_v60 }
 0x553   :  { %1718 = vmatpush.msrb.mxu3 %v1667_v61 }
 0x554   :  { %1700 = vmatpush.msrb.mxu2 %v1649_v62 }
 0x555   :  { %1719 = vmatpush.msrb.mxu3 %v1666_v63 }
 0x557   :  { %1720 = vmatpush.msrb.mxu3 %v1665_v0 }
 0x5cd   :  { %v1605_v2 = vpop.f32.mrf.mxu0 }
 0x5ce   :  { %v1606_v3 = vadd.f32 %v1842_v1, %v1605_v2  ;;  %v1628_v4 = vpop.f32.mrf.mxu1 }
 0x5cf   :  { %v1629_v5 = vadd.f32 %v1842_v1, %v1628_v4 }
 0x5d0   :  { %v1633_v6 = vmul.f32 0.044715, %v1606_v3  ;;  %v1631_v21 = vmul.f32 0.5, %v1606_v3 }
 0x5d1   :  { %v1634_v7 = vmul.f32 0.044715, %v1629_v5  ;;  %v1632_v23 = vmul.f32 0.5, %v1629_v5 }
 0x5d2   :  { %v1635_v8 = vmul.f32 %v1633_v6, %v1606_v3 }
 0x5d3   :  { %v1636_v9 = vmul.f32 %v1634_v7, %v1629_v5 }
 0x5d4   :  { %v1637_v11 = vmul.f32 %v1635_v8, %v1606_v3 }
 0x5d5   :  { %v1638_v14 = vmul.f32 %v1636_v9, %v1629_v5 }
 0x5d6   :  { %v1639_v15 = vadd.f32 %v1637_v11, %v1606_v3 }
 0x5d7   :  { %v1640_v16 = vadd.f32 %v1638_v14, %v1629_v5 }
 0x5d8   :  { %v1641_v13 = vmul.f32 0.7978846, %v1639_v15 }
 0x5d9   :  { %v1642_v17 = vmul.f32 0.7978846, %v1640_v16 }
 0x5da   :  { %1886 = vtanh.f32 %v1641_v13 }
 0x5db   :  { %1888 = vtanh.f32 %v1642_v17 }
 0x5e0   :  { %v1887_v19 = vpop.eup %1886 }
 0x5e1   :  { %v1889_v20 = vpop.eup %1888  ;;  %v1645_v22 = vadd.f32 1.0, %v1887_v19 }
 0x5e2   :  { %v1646_v24 = vadd.f32 1.0, %v1889_v20 }
 0x5e3   :  { %v1647_v12 = vmul.f32 %v1645_v22, %v1631_v21 }
 0x5e4   :  { %v1648_v25 = vmul.f32 %v1646_v24, %v1632_v23 }
 0x5e5   :  { %1701 = vmatmul.f32.vlgmr.msrb.gmra.mxu2 %v1647_v12 }
 0x5e6   :  { %1721 = vmatmul.f32.vlgmr.msrb.gmra.mxu3 %v1648_v25 }
 0x668   :  { %v1702_v26 = vpop.f32.mrf.mxu2 }
 0x669   :  { %v1703_v27 = vadd.f32 %v1843_v10, %v1702_v26  ;;  %v1722_v28 = vpop.f32.mrf.mxu3 }
 0x66a   :  { %v1723_v29 = vadd.f32 %v1843_v10, %v1722_v28 }
 0x66b   :  { %v1725_v30 = vadd.f32 %v1703_v27, %v2579_v44 }
 0x66c   :  { %v1726_v18 = vadd.f32 %v1723_v29, %v2584_v46 }
 0x66d   :  { %1727 = vst.msk [vmem:[#allocation2] sm:$0xff] %vm51_vm0, %v1725_v30 }
 0x66e   :  { %1728 = vst.msk [vmem:[#allocation2 + $0x8] sm:$0xff] %vm51_vm0, %v1726_v18 }
 0x66f   :  { %1741 = dma.vmem_to_hbm [thread:$0]  %s1734_s14, 256, %s1736_s16, [#allocation3], %s1920_s12, %s1920_s12, %s1921_s17  }
 0x670   :  { %1916 = dma.done.wait [#allocation3], 256  }
 0x671   :  { %1917 = vsyncadd [#allocation3], 4294967040 }
 0x672   :  { %1750 = vsyncpa [#allocation3], 1 }

</bundles_post_ra>
